<compile_context>
chip_gen: v7x
topology: tpu7x:2x2x1
jax: 0.10.0
libtpu: 0.0.40
codegen_flags: <defaults>
</compile_context>

<pallas_src>
import functools

import jax
import jax.numpy as jnp
from jax.experimental import pallas as pl
from jax.experimental.pallas import tpu as pltpu

F_HID = 128      # GCN hidden width (gc1/gc2/gc3 output)
F_FC = 128       # padded head width (fc1: 64 -> 128, fc2: n_classes -> 128)
NUM_LAYERS = 3


def _round_up(x, m):
    return (x + m - 1) // m * m


# ------------------------------ fused kernel -------------------------------

def _gcn_fused_kernel(a_ref, x_ref, w_ref, b_ref, p_ref,
                      wfc1_ref, bfc1_ref, wfc2_ref, bfc2_ref,
                      out_ref, z_ref, h0_ref, h1_ref, *, tm):
    l = pl.program_id(0)          # layer index   0..2   (slow axis)
    i = pl.program_id(1)          # A_hat row-tile index (fast axis)
    nrt = pl.num_programs(1)

    # --- per-layer prologue (hoisted out of the row loop): Z = H_in @ W_l ----
    # layer 0 reads X, layer 1 reads h0, layer 2 reads h1 (ping-pong).
    @pl.when(i == 0)
    def _():
        w = w_ref[0]                                            # [128, 128] bf16

        @pl.when(l == 0)
        def _():
            z_ref[...] = jnp.dot(x_ref[...], w,
                                 preferred_element_type=jnp.float32
                                 ).astype(z_ref.dtype)

        @pl.when(l == 1)
        def _():
            z_ref[...] = jnp.dot(h0_ref[...], w,
                                 preferred_element_type=jnp.float32
                                 ).astype(z_ref.dtype)

        @pl.when(l == 2)
        def _():
            z_ref[...] = jnp.dot(h1_ref[...], w,
                                 preferred_element_type=jnp.float32
                                 ).astype(z_ref.dtype)

    # --- row-tile aggregation: H_out[tile] = relu(A_hat[tile, :] @ Z + b) ----
    acc = jnp.dot(a_ref[...], z_ref[...],
                  preferred_element_type=jnp.float32)           # [tm, 128] f32
    h_out = jnp.maximum(acc + b_ref[0], 0.0).astype(h0_ref.dtype)
    row = pl.multiple_of(i * tm, tm)

    @pl.when(l % 2 == 0)          # layers 0 and 2 write the "ping" buffer
    def _():
        h0_ref[pl.ds(row, tm), :] = h_out

    @pl.when(l % 2 == 1)          # layer 1 writes the "pong" buffer
    def _():
        h1_ref[pl.ds(row, tm), :] = h_out

    # --- epilogue (last layer, last tile): mean pool + fc1 + relu + fc2 ------
    @pl.when(jnp.logical_and(l == NUM_LAYERS - 1, i == nrt - 1))
    def _():
        hg = jnp.dot(p_ref[...], h0_ref[...],
                     preferred_element_type=jnp.float32)        # [G_pad, 128]
        z1 = jnp.dot(hg.astype(wfc1_ref.dtype), wfc1_ref[...],
                     preferred_element_type=jnp.float32) + bfc1_ref[...]
        z1 = jnp.maximum(z1, 0.0)
        out_ref[...] = jnp.dot(z1.astype(wfc2_ref.dtype), wfc2_ref[...],
                               preferred_element_type=jnp.float32) + bfc2_ref[...]


# ------------------------------ host wrapper --------------------------------

def gcn_forward_pallas(params, x, a_hat, pool_mat, n_classes):
    n, f_in = x.shape
    g = pool_mat.shape[0]
    assert f_in <= F_HID, "node feature dim > 128 not supported by this kernel"

    # ---- pad to TPU-friendly shapes ----
    tm = min(256, _round_up(n, 128))          # A_hat row tile
    n_pad = _round_up(n, tm)
    g_pad = _round_up(g, 8)

    x_p = jnp.zeros((n_pad, F_HID), jnp.bfloat16).at[:n, :f_in].set(
        x.astype(jnp.bfloat16))
    a_p = jnp.zeros((n_pad, n_pad), jnp.bfloat16).at[:n, :n].set(
        a_hat.astype(jnp.bfloat16))
    p_p = jnp.zeros((g_pad, n_pad), jnp.bfloat16).at[:g, :n].set(
        pool_mat.astype(jnp.bfloat16))

    # stack the three GCNConv weights into [3, 128, 128] (layer 1 F_in zero-padded)
    (w1, b1), (w2, b2), (w3, b3) = params["gc1"], params["gc2"], params["gc3"]
    w_stack = jnp.zeros((NUM_LAYERS, F_HID, F_HID), jnp.bfloat16)
    w_stack = w_stack.at[0, :f_in, :].set(w1.astype(jnp.bfloat16))
    w_stack = w_stack.at[1].set(w2.astype(jnp.bfloat16))
    w_stack = w_stack.at[2].set(w3.astype(jnp.bfloat16))
    b_stack = jnp.stack([b1, b2, b3]).reshape(NUM_LAYERS, 1, F_HID).astype(jnp.float32)

    # head params padded to lane-dense 128 widths (sliced back in the wrapper)
    (wf1, bf1), (wf2, bf2) = params["fc1"], params["fc2"]
    h1_dim = wf1.shape[1]                     # 64
    wfc1 = jnp.zeros((F_HID, F_FC), jnp.bfloat16).at[:, :h1_dim].set(
        wf1.astype(jnp.bfloat16))
    bfc1 = jnp.zeros((1, F_FC), jnp.float32).at[0, :h1_dim].set(bf1)
    wfc2 = jnp.zeros((F_FC, F_FC), jnp.bfloat16).at[:h1_dim, :n_classes].set(
        wf2.astype(jnp.bfloat16))
    bfc2 = jnp.zeros((1, F_FC), jnp.float32).at[0, :n_classes].set(bf2)

    r = n_pad // tm
    grid = (NUM_LAYERS, r)

    # advisory cost estimate (dominant term: 3x A_hat @ Z aggregation)
    flops = 2 * NUM_LAYERS * (n_pad * n_pad * F_HID + n_pad * F_HID * F_HID)
    bytes_accessed = int(
        NUM_LAYERS * a_p.size * 2 + x_p.size * 2 + p_p.size * 2
        + w_stack.size * 2 + wfc1.size * 2 + wfc2.size * 2
        + 4 * (b_stack.size + bfc1.size + bfc2.size) + g_pad * F_FC * 4)
    cost = pl.CostEstimate(flops=int(flops), transcendentals=0,
                           bytes_accessed=bytes_accessed)

    # VMEM budget: double-buffered A tile + resident X/Z/H0/H1 slabs + params
    vmem_est = (2 * tm * n_pad * 2          # A_hat tile (bf16, double-buffered)
                + 4 * n_pad * F_HID * 2     # X, Z, H0, H1 slabs (bf16)
                + g_pad * n_pad * 2         # pool matrix
                + 8 * F_HID * F_FC * 2)     # weights / bias headroom
    vmem_limit = int(min(max(2 * vmem_est, 32 * 2**20), 64 * 2**20))

    kernel = functools.partial(_gcn_fused_kernel, tm=tm)

    out_pad = pl.pallas_call(
        kernel,
        out_shape=jax.ShapeDtypeStruct((g_pad, F_FC), jnp.float32),
        grid_spec=pltpu.PrefetchScalarGridSpec(
            num_scalar_prefetch=0,
            grid=grid,
            in_specs=[
                pl.BlockSpec((tm, n_pad), lambda l, i: (i, 0)),           # A_hat tile
                pl.BlockSpec((n_pad, F_HID), lambda l, i: (0, 0)),        # X (resident)
                pl.BlockSpec((1, F_HID, F_HID), lambda l, i: (l, 0, 0)),  # W_l
                pl.BlockSpec((1, 1, F_HID), lambda l, i: (l, 0, 0)),      # b_l
                pl.BlockSpec((g_pad, n_pad), lambda l, i: (0, 0)),        # pool matrix
                pl.BlockSpec((F_HID, F_FC), lambda l, i: (0, 0)),         # fc1 W
                pl.BlockSpec((1, F_FC), lambda l, i: (0, 0)),             # fc1 b
                pl.BlockSpec((F_FC, F_FC), lambda l, i: (0, 0)),          # fc2 W
                pl.BlockSpec((1, F_FC), lambda l, i: (0, 0)),             # fc2 b
            ],
            out_specs=pl.BlockSpec((g_pad, F_FC), lambda l, i: (0, 0)),
            scratch_shapes=[
                pltpu.VMEM((n_pad, F_HID), jnp.bfloat16),   # Z = H_in @ W_l
                pltpu.VMEM((n_pad, F_HID), jnp.bfloat16),   # H ping buffer
                pltpu.VMEM((n_pad, F_HID), jnp.bfloat16),   # H pong buffer
            ],
        ),
        compiler_params=pltpu.CompilerParams(
            # cross-layer dependency (layer l+1 needs all of layer l's H) forces
            # the row-tile axis to stay "arbitrary" in the fused kernel.
            dimension_semantics=("arbitrary", "arbitrary"),
            vmem_limit_bytes=vmem_limit,
        ),
        cost_estimate=cost,
    )(a_p, x_p, w_stack, b_stack, p_p, wfc1, bfc1, wfc2, bfc2)

    return out_pad[:g, :n_classes]


# ------------------------------- glue (JAX) ---------------------------------

def build_norm_adj(edge_index, num_nodes):
    """Dense A_hat = D^-1/2 (A + I) D^-1/2 (torch_geometric GCNConv defaults)."""
    src, dst = edge_index[0], edge_index[1]
    a = jnp.zeros((num_nodes, num_nodes), jnp.float32)
    a = a.at[src, dst].set(1.0)
    a = a + jnp.eye(num_nodes, dtype=jnp.float32)        # add self loops
    deg = jnp.sum(a, axis=1)
    d_inv_sqrt = jnp.where(deg > 0, 1.0 / jnp.sqrt(deg), 0.0)
    return a * d_inv_sqrt[:, None] * d_inv_sqrt[None, :]


def build_pool_matrix(batch, num_graphs):
    """P[g, n] = 1/|graph g| if node n in graph g  (== global_mean_pool)."""
    onehot = (batch[None, :] == jnp.arange(num_graphs)[:, None]).astype(jnp.float32)
    counts = jnp.sum(onehot, axis=1, keepdims=True)
    return onehot / jnp.maximum(counts, 1.0)


def init_params(key, n_node_feats, n_classes):
    def dense(k, fin, fout):
        kw, kb = jax.random.split(k)
        lim = 1.0 / jnp.sqrt(jnp.float32(fin))
        w = jax.random.uniform(kw, (fin, fout), jnp.float32, -lim, lim)
        b = jax.random.uniform(kb, (fout,), jnp.float32, -lim, lim)
        return w, b

    ks = jax.random.split(key, 5)
    return {
        "gc1": dense(ks[0], n_node_feats, F_HID),
        "gc2": dense(ks[1], F_HID, F_HID),
        "gc3": dense(ks[2], F_HID, F_HID),
        "fc1": dense(ks[3], F_HID, 64),
        "fc2": dense(ks[4], 64, n_classes),
    }


def gcn_forward_ref(params, x, a_hat, pool_mat):
    """Pure-JAX f32 reference (same math, unpadded)."""
    h = x
    for name in ("gc1", "gc2", "gc3"):
        w, b = params[name]
        h = jax.nn.relu(a_hat @ (h @ w) + b)
    hg = pool_mat @ h
    w1, b1 = params["fc1"]
    w2, b2 = params["fc2"]
    return jax.nn.relu(hg @ w1 + b1) @ w2 + b2


# ---------------------------------- main -------------------------------------

if __name__ == "__main__":
    key = jax.random.PRNGKey(0)
    k_x, k_p = jax.random.split(key)

    N_NODE_FEATS = 8
    N_CLASSES = 4
    NODES_PER_GRAPH = 8
    NUM_GRAPHS = 2
    N = NODES_PER_GRAPH * NUM_GRAPHS

    # node features
    x = jax.random.normal(k_x, (N, N_NODE_FEATS), jnp.float32)

    # deterministic edge_index: bidirectional ring within each graph
    srcs, dsts = [], []
    for gidx in range(NUM_GRAPHS):
        base = gidx * NODES_PER_GRAPH
        for i in range(NODES_PER_GRAPH):
            u = base + i
            v = base + (i + 1) % NODES_PER_GRAPH
            srcs += [u, v]
            dsts += [v, u]
    edge_index = jnp.array([srcs, dsts], dtype=jnp.int32)

    # batch assignment vector (node -> graph id)
    batch = jnp.repeat(jnp.arange(NUM_GRAPHS, dtype=jnp.int32), NODES_PER_GRAPH)

    params = init_params(k_p, N_NODE_FEATS, N_CLASSES)

    a_hat = build_norm_adj(edge_index, N)
    pool_mat = build_pool_matrix(batch, NUM_GRAPHS)

    out = gcn_forward_pallas(params, x, a_hat, pool_mat, N_CLASSES)
    out = jax.block_until_ready(out)
    assert out.shape == (NUM_GRAPHS, N_CLASSES)

    # validate bf16 kernel against f32 reference (loose tol for bf16 streaming)
    ref = gcn_forward_ref(params, x, a_hat, pool_mat)
    assert bool(jnp.all(jnp.isfinite(out)))
    assert bool(jnp.allclose(out, ref, atol=5e-2, rtol=5e-2)), (out, ref)

    print("KERNEL_OK")
</pallas_src>

<mosaic_0001>
module attributes {stable_mosaic.version = 11 : i64} {
  func.func @_gcn_fused_kernel(%arg0: i32, %arg1: i32, %arg2: memref<128x128xbf16, #tpu.memory_space<vmem>>, %arg3: memref<128x128xbf16, #tpu.memory_space<vmem>>, %arg4: memref<1x128x128xbf16, #tpu.memory_space<vmem>>, %arg5: memref<1x1x128xf32, #tpu.memory_space<vmem>>, %arg6: memref<8x128xbf16, #tpu.memory_space<vmem>>, %arg7: memref<128x128xbf16, #tpu.memory_space<vmem>>, %arg8: memref<1x128xf32, #tpu.memory_space<vmem>>, %arg9: memref<128x128xbf16, #tpu.memory_space<vmem>>, %arg10: memref<1x128xf32, #tpu.memory_space<vmem>>, %arg11: memref<8x128xf32, #tpu.memory_space<vmem>>, %arg12: memref<128x128xbf16, #tpu.memory_space<vmem>>, %arg13: memref<128x128xbf16, #tpu.memory_space<vmem>>, %arg14: memref<128x128xbf16, #tpu.memory_space<vmem>>) attributes {dimension_semantics = [#tpu.dimension_semantics<arbitrary>, #tpu.dimension_semantics<arbitrary>], iteration_bounds = array<i64: 3, 1>, scalar_prefetch = 0 : i64, scratch_operands = 3 : i64, tpu.core_type = #tpu.core_type<tc>, window_params = [{transform_indices = @transform_0, window_bounds = array<i64: 128, 128>}, {pipeline_mode = #tpu.pipeline_mode<synchronous>, transform_indices = @transform_1, window_bounds = array<i64: 128, 128>}, {transform_indices = @transform_2, window_bounds = array<i64: 1, 128, 128>}, {transform_indices = @transform_3, window_bounds = array<i64: 1, 1, 128>}, {pipeline_mode = #tpu.pipeline_mode<synchronous>, transform_indices = @transform_4, window_bounds = array<i64: 8, 128>}, {pipeline_mode = #tpu.pipeline_mode<synchronous>, transform_indices = @transform_5, window_bounds = array<i64: 128, 128>}, {pipeline_mode = #tpu.pipeline_mode<synchronous>, transform_indices = @transform_6, window_bounds = array<i64: 1, 128>}, {pipeline_mode = #tpu.pipeline_mode<synchronous>, transform_indices = @transform_7, window_bounds = array<i64: 128, 128>}, {pipeline_mode = #tpu.pipeline_mode<synchronous>, transform_indices = @transform_8, window_bounds = array<i64: 1, 128>}, {pipeline_mode = #tpu.pipeline_mode<synchronous>, transform_indices = @transform_9, window_bounds = array<i64: 8, 128>}]} {
    %c0_i32 = arith.constant 0 : i32
    %0 = arith.cmpi eq, %arg1, %c0_i32 : i32
    %1 = arith.extui %0 : i1 to i32
    %c0_i32_0 = arith.constant 0 : i32
    %2 = arith.cmpi ne, %1, %c0_i32_0 : i32
    scf.if %2 {
      %c0_25 = arith.constant 0 : index
      %c0_26 = arith.constant 0 : index
      %c0_27 = arith.constant 0 : index
      %46 = vector.load %arg4[%c0_25, %c0_26, %c0_27] : memref<1x128x128xbf16, #tpu.memory_space<vmem>>, vector<1x128x128xbf16>
      %47 = vector.shape_cast %46 : vector<1x128x128xbf16> to vector<128x128xbf16>
      %c0_i32_28 = arith.constant 0 : i32
      %48 = arith.cmpi eq, %arg0, %c0_i32_28 : i32
      %49 = arith.extui %48 : i1 to i32
      %c0_i32_29 = arith.constant 0 : i32
      %50 = arith.cmpi ne, %49, %c0_i32_29 : i32
      scf.if %50 {
        %c0_34 = arith.constant 0 : index
        %c0_35 = arith.constant 0 : index
        %57 = vector.load %arg3[%c0_34, %c0_35] : memref<128x128xbf16, #tpu.memory_space<vmem>>, vector<128x128xbf16>
        %cst_36 = arith.constant dense<0.000000e+00> : vector<128x128xf32>
        %58 = tpu.matmul %57, %47, %cst_36 {dimension_numbers = #tpu.dot_dimension_numbers<[1], [0], [0], [1], [0, 0, 1, 1], [], []>} : vector<128x128xbf16>, vector<128x128xbf16>, vector<128x128xf32> -> vector<128x128xf32>
        %59 = arith.truncf %58 : vector<128x128xf32> to vector<128x128xbf16>
        %c0_37 = arith.constant 0 : index
        %c0_38 = arith.constant 0 : index
        %60 = vector.load %arg12[%c0_37, %c0_38] : memref<128x128xbf16, #tpu.memory_space<vmem>>, vector<128x128xbf16>
        tpu.vector_store %arg12[%c0_37, %c0_38], %59 {strides = array<i32>} : memref<128x128xbf16, #tpu.memory_space<vmem>>, vector<128x128xbf16>,
      } else {
      }
      %c1_i32_30 = arith.constant 1 : i32
      %51 = arith.cmpi eq, %arg0, %c1_i32_30 : i32
      %52 = arith.extui %51 : i1 to i32
      %c0_i32_31 = arith.constant 0 : i32
      %53 = arith.cmpi ne, %52, %c0_i32_31 : i32
      scf.if %53 {
        %c0_34 = arith.constant 0 : index
        %c0_35 = arith.constant 0 : index
        %57 = vector.load %arg13[%c0_34, %c0_35] : memref<128x128xbf16, #tpu.memory_space<vmem>>, vector<128x128xbf16>
        %cst_36 = arith.constant dense<0.000000e+00> : vector<128x128xf32>
        %58 = tpu.matmul %57, %47, %cst_36 {dimension_numbers = #tpu.dot_dimension_numbers<[1], [0], [0], [1], [0, 0, 1, 1], [], []>} : vector<128x128xbf16>, vector<128x128xbf16>, vector<128x128xf32> -> vector<128x128xf32>
        %59 = arith.truncf %58 : vector<128x128xf32> to vector<128x128xbf16>
        %c0_37 = arith.constant 0 : index
        %c0_38 = arith.constant 0 : index
        %60 = vector.load %arg12[%c0_37, %c0_38] : memref<128x128xbf16, #tpu.memory_space<vmem>>, vector<128x128xbf16>
        tpu.vector_store %arg12[%c0_37, %c0_38], %59 {strides = array<i32>} : memref<128x128xbf16, #tpu.memory_space<vmem>>, vector<128x128xbf16>,
      } else {
      }
      %c2_i32_32 = arith.constant 2 : i32
      %54 = arith.cmpi eq, %arg0, %c2_i32_32 : i32
      %55 = arith.extui %54 : i1 to i32
      %c0_i32_33 = arith.constant 0 : i32
      %56 = arith.cmpi ne, %55, %c0_i32_33 : i32
      scf.if %56 {
        %c0_34 = arith.constant 0 : index
        %c0_35 = arith.constant 0 : index
        %57 = vector.load %arg14[%c0_34, %c0_35] : memref<128x128xbf16, #tpu.memory_space<vmem>>, vector<128x128xbf16>
        %cst_36 = arith.constant dense<0.000000e+00> : vector<128x128xf32>
        %58 = tpu.matmul %57, %47, %cst_36 {dimension_numbers = #tpu.dot_dimension_numbers<[1], [0], [0], [1], [0, 0, 1, 1], [], []>} : vector<128x128xbf16>, vector<128x128xbf16>, vector<128x128xf32> -> vector<128x128xf32>
        %59 = arith.truncf %58 : vector<128x128xf32> to vector<128x128xbf16>
        %c0_37 = arith.constant 0 : index
        %c0_38 = arith.constant 0 : index
        %60 = vector.load %arg12[%c0_37, %c0_38] : memref<128x128xbf16, #tpu.memory_space<vmem>>, vector<128x128xbf16>
        tpu.vector_store %arg12[%c0_37, %c0_38], %59 {strides = array<i32>} : memref<128x128xbf16, #tpu.memory_space<vmem>>, vector<128x128xbf16>,
      } else {
      }
    } else {
    }
    %c0 = arith.constant 0 : index
    %c0_1 = arith.constant 0 : index
    %3 = vector.load %arg2[%c0, %c0_1] : memref<128x128xbf16, #tpu.memory_space<vmem>>, vector<128x128xbf16>
    %c0_2 = arith.constant 0 : index
    %c0_3 = arith.constant 0 : index
    %4 = vector.load %arg12[%c0_2, %c0_3] : memref<128x128xbf16, #tpu.memory_space<vmem>>, vector<128x128xbf16>
    %cst = arith.constant dense<0.000000e+00> : vector<128x128xf32>
    %5 = tpu.matmul %3, %4, %cst {dimension_numbers = #tpu.dot_dimension_numbers<[1], [0], [0], [1], [0, 0, 1, 1], [], []>} : vector<128x128xbf16>, vector<128x128xbf16>, vector<128x128xf32> -> vector<128x128xf32>
    %c0_4 = arith.constant 0 : index
    %c0_5 = arith.constant 0 : index
    %c0_6 = arith.constant 0 : index
    %6 = vector.load %arg5[%c0_4, %c0_5, %c0_6] : memref<1x1x128xf32, #tpu.memory_space<vmem>>, vector<1x1x128xf32>
    %7 = vector.shape_cast %6 : vector<1x1x128xf32> to vector<1x128xf32>
    %8 = vector.broadcast %7 : vector<1x128xf32> to vector<128x128xf32>
    %9 = arith.addf %5, %8 : vector<128x128xf32>
    %cst_7 = arith.constant 0.000000e+00 : f32
    %10 = vector.broadcast %cst_7 : f32 to vector<128x128xf32>
    %11 = arith.maximumf %9, %10 : vector<128x128xf32>
    %12 = arith.truncf %11 : vector<128x128xf32> to vector<128x128xbf16>
    %c128_i32 = arith.constant 128 : i32
    %13 = arith.muli %arg1, %c128_i32 : i32
    %14 = tpu.assume_multiple %13, 128 : i32
    %c2_i32 = arith.constant 2 : i32
    %c0_i32_8 = arith.constant 0 : i32
    %15 = arith.cmpi eq, %c2_i32, %c0_i32_8 : i32
    %c1_i32 = arith.constant 1 : i32
    %16 = arith.select %15, %c1_i32, %c2_i32 : i32
    %17 = arith.remsi %arg0, %16 : i32
    %c0_i32_9 = arith.constant 0 : i32
    %18 = arith.cmpi ne, %17, %c0_i32_9 : i32
    %c0_i32_10 = arith.constant 0 : i32
    %19 = arith.cmpi slt, %17, %c0_i32_10 : i32
    %c0_i32_11 = arith.constant 0 : i32
    %20 = arith.cmpi slt, %16, %c0_i32_11 : i32
    %21 = arith.xori %19, %20 : i1
    %22 = arith.andi %21, %18 : i1
    %23 = arith.addi %17, %16 : i32
    %24 = arith.select %22, %23, %17 : i32
    %c0_i32_12 = arith.constant 0 : i32
    %25 = arith.cmpi eq, %24, %c0_i32_12 : i32
    %26 = arith.extui %25 : i1 to i32
    %c0_i32_13 = arith.constant 0 : i32
    %27 = arith.cmpi ne, %26, %c0_i32_13 : i32
    scf.if %27 {
      %46 = arith.index_cast %14 : i32 to index
      %c0_25 = arith.constant 0 : index
      %47 = vector.load %arg13[%46, %c0_25] : memref<128x128xbf16, #tpu.memory_space<vmem>>, vector<128x128xbf16>
      tpu.vector_store %arg13[%46, %c0_25], %12 {strides = array<i32>} : memref<128x128xbf16, #tpu.memory_space<vmem>>, vector<128x128xbf16>,
    } else {
    }
    %c2_i32_14 = arith.constant 2 : i32
    %c0_i32_15 = arith.constant 0 : i32
    %28 = arith.cmpi eq, %c2_i32_14, %c0_i32_15 : i32
    %c1_i32_16 = arith.constant 1 : i32
    %29 = arith.select %28, %c1_i32_16, %c2_i32_14 : i32
    %30 = arith.remsi %arg0, %29 : i32
    %c0_i32_17 = arith.constant 0 : i32
    %31 = arith.cmpi ne, %30, %c0_i32_17 : i32
    %c0_i32_18 = arith.constant 0 : i32
    %32 = arith.cmpi slt, %30, %c0_i32_18 : i32
    %c0_i32_19 = arith.constant 0 : i32
    %33 = arith.cmpi slt, %29, %c0_i32_19 : i32
    %34 = arith.xori %32, %33 : i1
    %35 = arith.andi %34, %31 : i1
    %36 = arith.addi %30, %29 : i32
    %37 = arith.select %35, %36, %30 : i32
    %c1_i32_20 = arith.constant 1 : i32
    %38 = arith.cmpi eq, %37, %c1_i32_20 : i32
    %39 = arith.extui %38 : i1 to i32
    %c0_i32_21 = arith.constant 0 : i32
    %40 = arith.cmpi ne, %39, %c0_i32_21 : i32
    scf.if %40 {
      %46 = arith.index_cast %14 : i32 to index
      %c0_25 = arith.constant 0 : index
      %47 = vector.load %arg14[%46, %c0_25] : memref<128x128xbf16, #tpu.memory_space<vmem>>, vector<128x128xbf16>
      tpu.vector_store %arg14[%46, %c0_25], %12 {strides = array<i32>} : memref<128x128xbf16, #tpu.memory_space<vmem>>, vector<128x128xbf16>,
    } else {
    }
    %c2_i32_22 = arith.constant 2 : i32
    %41 = arith.cmpi eq, %arg0, %c2_i32_22 : i32
    %c0_i32_23 = arith.constant 0 : i32
    %42 = arith.cmpi eq, %arg1, %c0_i32_23 : i32
    %43 = arith.andi %41, %42 : i1
    %44 = arith.extui %43 : i1 to i32
    %c0_i32_24 = arith.constant 0 : i32
    %45 = arith.cmpi ne, %44, %c0_i32_24 : i32
    scf.if %45 {
      %c0_25 = arith.constant 0 : index
      %c0_26 = arith.constant 0 : index
      %46 = vector.load %arg6[%c0_25, %c0_26] : memref<8x128xbf16, #tpu.memory_space<vmem>>, vector<8x128xbf16>
      %c0_27 = arith.constant 0 : index
      %c0_28 = arith.constant 0 : index
      %47 = vector.load %arg13[%c0_27, %c0_28] : memref<128x128xbf16, #tpu.memory_space<vmem>>, vector<128x128xbf16>
      %cst_29 = arith.constant dense<0.000000e+00> : vector<8x128xf32>
      %48 = tpu.matmul %46, %47, %cst_29 {dimension_numbers = #tpu.dot_dimension_numbers<[1], [0], [0], [1], [0, 0, 1, 1], [], []>} : vector<8x128xbf16>, vector<128x128xbf16>, vector<8x128xf32> -> vector<8x128xf32>
      %49 = arith.truncf %48 : vector<8x128xf32> to vector<8x128xbf16>
      %c0_30 = arith.constant 0 : index
      %c0_31 = arith.constant 0 : index
      %50 = vector.load %arg7[%c0_30, %c0_31] : memref<128x128xbf16, #tpu.memory_space<vmem>>, vector<128x128xbf16>
      %cst_32 = arith.constant dense<0.000000e+00> : vector<8x128xf32>
      %51 = tpu.matmul %49, %50, %cst_32 {dimension_numbers = #tpu.dot_dimension_numbers<[1], [0], [0], [1], [0, 0, 1, 1], [], []>} : vector<8x128xbf16>, vector<128x128xbf16>, vector<8x128xf32> -> vector<8x128xf32>
      %c0_33 = arith.constant 0 : index
      %c0_34 = arith.constant 0 : index
      %52 = vector.load %arg8[%c0_33, %c0_34] : memref<1x128xf32, #tpu.memory_space<vmem>>, vector<1x128xf32>
      %53 = vector.broadcast %52 : vector<1x128xf32> to vector<8x128xf32>
      %54 = arith.addf %51, %53 : vector<8x128xf32>
      %cst_35 = arith.constant 0.000000e+00 : f32
      %55 = vector.broadcast %cst_35 : f32 to vector<8x128xf32>
      %56 = arith.maximumf %54, %55 : vector<8x128xf32>
      %57 = arith.truncf %56 : vector<8x128xf32> to vector<8x128xbf16>
      %c0_36 = arith.constant 0 : index
      %c0_37 = arith.constant 0 : index
      %58 = vector.load %arg9[%c0_36, %c0_37] : memref<128x128xbf16, #tpu.memory_space<vmem>>, vector<128x128xbf16>
      %cst_38 = arith.constant dense<0.000000e+00> : vector<8x128xf32>
      %59 = tpu.matmul %57, %58, %cst_38 {dimension_numbers = #tpu.dot_dimension_numbers<[1], [0], [0], [1], [0, 0, 1, 1], [], []>} : vector<8x128xbf16>, vector<128x128xbf16>, vector<8x128xf32> -> vector<8x128xf32>
      %c0_39 = arith.constant 0 : index
      %c0_40 = arith.constant 0 : index
      %60 = vector.load %arg10[%c0_39, %c0_40] : memref<1x128xf32, #tpu.memory_space<vmem>>, vector<1x128xf32>
      %61 = vector.broadcast %60 : vector<1x128xf32> to vector<8x128xf32>
      %62 = arith.addf %59, %61 : vector<8x128xf32>
      %c0_41 = arith.constant 0 : index
      %c0_42 = arith.constant 0 : index
      %63 = vector.load %arg11[%c0_41, %c0_42] : memref<8x128xf32, #tpu.memory_space<vmem>>, vector<8x128xf32>
      tpu.vector_store %arg11[%c0_41, %c0_42], %62 {strides = array<i32>} : memref<8x128xf32, #tpu.memory_space<vmem>>, vector<8x128xf32>,
    } else {
    }
    return
  }
  func.func @transform_0(%arg0: i32, %arg1: i32) -> (i32, i32) {
    %c0_i32 = arith.constant 0 : i32
    %c0_i32_0 = arith.constant 0 : i32
    return %arg1, %c0_i32 : i32, i32
  }
  func.func @transform_1(%arg0: i32, %arg1: i32) -> (i32, i32) {
    %c0_i32 = arith.constant 0 : i32
    %c0_i32_0 = arith.constant 0 : i32
    %c0_i32_1 = arith.constant 0 : i32
    return %c0_i32, %c0_i32_0 : i32, i32
  }
  func.func @transform_2(%arg0: i32, %arg1: i32) -> (i32, i32, i32) {
    %c0_i32 = arith.constant 0 : i32
    %c0_i32_0 = arith.constant 0 : i32
    %c0_i32_1 = arith.constant 0 : i32
    return %arg0, %c0_i32, %c0_i32_0 : i32, i32, i32
  }
  func.func @transform_3(%arg0: i32, %arg1: i32) -> (i32, i32, i32) {
    %c0_i32 = arith.constant 0 : i32
    %c0_i32_0 = arith.constant 0 : i32
    %c0_i32_1 = arith.constant 0 : i32
    return %arg0, %c0_i32, %c0_i32_0 : i32, i32, i32
  }
  func.func @transform_4(%arg0: i32, %arg1: i32) -> (i32, i32) {
    %c0_i32 = arith.constant 0 : i32
    %c0_i32_0 = arith.constant 0 : i32
    %c0_i32_1 = arith.constant 0 : i32
    return %c0_i32, %c0_i32_0 : i32, i32
  }
  func.func @transform_5(%arg0: i32, %arg1: i32) -> (i32, i32) {
    %c0_i32 = arith.constant 0 : i32
    %c0_i32_0 = arith.constant 0 : i32
    %c0_i32_1 = arith.constant 0 : i32
    return %c0_i32, %c0_i32_0 : i32, i32
  }
  func.func @transform_6(%arg0: i32, %arg1: i32) -> (i32, i32) {
    %c0_i32 = arith.constant 0 : i32
    %c0_i32_0 = arith.constant 0 : i32
    %c0_i32_1 = arith.constant 0 : i32
    return %c0_i32, %c0_i32_0 : i32, i32
  }
  func.func @transform_7(%arg0: i32, %arg1: i32) -> (i32, i32) {
    %c0_i32 = arith.constant 0 : i32
    %c0_i32_0 = arith.constant 0 : i32
    %c0_i32_1 = arith.constant 0 : i32
    return %c0_i32, %c0_i32_0 : i32, i32
  }
  func.func @transform_8(%arg0: i32, %arg1: i32) -> (i32, i32) {
    %c0_i32 = arith.constant 0 : i32
    %c0_i32_0 = arith.constant 0 : i32
    %c0_i32_1 = arith.constant 0 : i32
    return %c0_i32, %c0_i32_0 : i32, i32
  }
  func.func @transform_9(%arg0: i32, %arg1: i32) -> (i32, i32) {
    %c0_i32 = arith.constant 0 : i32
    %c0_i32_0 = arith.constant 0 : i32
    %c0_i32_1 = arith.constant 0 : i32
    return %c0_i32, %c0_i32_0 : i32, i32
  }
}

</mosaic_0001>

<bundles_post_ra>
// kernel: tpu_custom_call.1
= control target key start
LH: loop header
LB: loop body
LE: loop exit
PB: predicated region body
PF: predicated region fallthrough
CT: control target
= control target key end

     0   :  { %s2970_s0 = inlined_call_operand.hbm [shape: bf16[128,128], index: 0, kind: input, shape index: {}]   ;;  %s2971_s1 = inlined_call_operand.hbm [shape: bf16[128,128], index: 1, kind: input, shape index: {}]   ;;  %s2972_s2 = inlined_call_operand.hbm [shape: bf16[3,128,128], index: 2, kind: input, shape index: {}]   ;;  %s2973_s3 = inlined_call_operand.vmem [shape: f32[3,1,128], index: 3, kind: input, shape index: {}]   ;;  %s2974_s4 = inlined_call_operand.vmem [shape: bf16[8,128], index: 4, kind: input, shape index: {}]   ;;  %s2975_s5 = inlined_call_operand.hbm [shape: bf16[128,128], index: 5, kind: input, shape index: {}]   ;;  %s2976_s6 = inlined_call_operand.vmem [shape: f32[1,128], index: 6, kind: input, shape index: {}]   ;;  %s2977_s7 = inlined_call_operand.hbm [shape: bf16[128,128], index: 7, kind: input, shape index: {}]   ;;  %s2978_s8 = inlined_call_operand.vmem [shape: f32[1,128], index: 8, kind: input, shape index: {}]   ;;  %s2979_s9 = inlined_call_operand.hbm [shape: f32[8,128], index: 9, kind: output, shape index: {}]  }
   0x1   :  { %2984 = sst [smem:[#allocation21_spill]] %s2976_s6 }
   0x2   :  { %2985 = sst [smem:[#allocation22_spill]] %s2978_s8 }
   0x3   :  { %2986 = sst [smem:[#allocation23_spill]] %s2979_s9 }
   0x4   :  { %14 = vsyncpa [#allocation6], 0 }
   0x5   :  { %15 = vsyncpa [#allocation9], 0 }
   0x6   :  { %16 = vsyncpa [#allocation13], 0 }
   0x7   :  { %17 = vsyncpa [#allocation7], 0  ;;  %s2542_s30 = smov 0   ;;  %s2544_s10 = smov 0  }
   0x8   :  { %s2546_s11 = smov 0   ;;  %s2548_s12 = smov 0  }
   0x9   :  { %s2550_s13 = smov 0   ;;  %s2552_s14 = smov 0  }
   0xa LB: > { %s2571_s15 = sadd.s32 4294967295, %s2480_s14   ;;  %p102_p0 = scmp.ne.s32.totalorder %s2464_s10, %s2460_s30  ;;  %s2480_s14 = sphi %s2552_s14, %s23_s14   ;;  %s2476_s13 = sphi %s2550_s13, %s3010_s13   ;;  %s2472_s12 = sphi %s2548_s12, %s3009_s12   ;;  %s2468_s11 = sphi %s2546_s11, %s3008_s11   ;;  %s2464_s10 = sphi %s2544_s10, %s3007_s10   ;;  %s2460_s30 = sphi %s2542_s30, %s3006_s30  }
   0xb   : > { %p2980_p1 = scmp.eq.s32.totalorder %s2571_s15, 0  ;;  %p1671_p2 = scmp.ge.s32.totalorder %s2480_s14, 1 }
   0xc   : > { %p265_p3 = scmp.lt.s32.totalorder %s2480_s14, 4  ;;  %s2482_s18 = smov [#allocation5]  }
   0xd   : > { %p2579_p4 = por %p2980_p1, %p102_p0  ;;  %s280_s19 = sshll.u32 %s2482_s18, 4  ;;  %s2587_s19 = int_to_ptr.vmem [resolvable:$true] %s280_s19 }
   0xe   : > { %p2583_p5 = pnand %p1671_p2, %p265_p3  ;;  %s2483_s21 = smov [#allocation8]  }
   0xf   : > { %s2987_s16 = scalar_select %p2579_p4, 1, 0 }
  0x10   : > { %s2988_s17 = scalar_select %p2583_p5, 1, 0 }
  0x11   : > { %p2125_p6 = pneg %p2583_p5  ;;  %s293_s22 = sshll.u32 %s2483_s21, 4  ;;  %s2597_s22 = int_to_ptr.vmem [resolvable:$true] %s293_s22 }
  0x12   : > { %s2484_s23 = smov [#allocation11]   ;;  %s2242_s27 = scalar_lea.hbm %s2970_s0, 1024 }
  0x13   : > { %p2593_p7 = pnand %p2125_p6, %p2980_p1  ;;  %s2599_s24 = sshll.u32 %s2484_s23, 4  ;;  %s310_s24 = int_to_ptr.vmem [resolvable:$true] %s2599_s24 }
  0x14   : > { %p2243_p8 = scmp.ne.s32.totalorder %s2970_s0, %s2242_s27  ;;  %p2249_p12 = scmp.lt.u32.totalorder %s2242_s27, %s2970_s0 }
  0x15   : > { %p2609_p9 = pneg %p2593_p7 }
  0x17   : > { %p2245_p10 = pnand %p2609_p9, %p2243_p8 }
  0x19   : > { %p2246_p11 = pneg %p2245_p10 }
  0x1b   : > { %p2251_p13 = pnand %p2249_p12, %p2246_p11 }
  0x1d   : > { %2254 = shalt.err (!%p2251_p13)
}
  0x1e   : > { %s2255_s23 = scalar_lea.vmem %s2587_s19, 1024  ;;  %p2263_p6 = scmp.lt.s32.totalorder %s2587_s19, %s2587_s19 }
  0x1f   : > { %p2256_p0 = scmp.ne.s32.totalorder %s2587_s19, %s2255_s23  ;;  %p2264_p1 = scmp.lt.s32.totalorder %s2255_s23, %s2255_s23 }
  0x21   : > { %p2258_p2 = pnand %p2256_p0, %p2609_p9  ;;  %p2265_p8 = por %p2264_p1, %p2263_p6 }
  0x23   : > { %p2259_p3 = pneg %p2258_p2 }
  0x25   : > { %p2266_p10 = pnand %p2265_p8, %p2259_p3 }
  0x27   : > { %2269 = shalt.err (!%p2266_p10)
}
  0x28   : > { %s2485_s25 = smov 64   ;;  %s2486_s26 = smov 4  }
  0x29   : > { %2128 = dma.hbm_to_vmem [thread:$0]  (!%p2593_p7), %s2970_s0, 1024, %s2587_s19, [#allocation6], %s2485_s25, %s2485_s25, %s2486_s26  }
  0x2a   : > { %s2270_s21 = scalar_lea.hbm %s2971_s1, 1024 }
  0x2b   : > { %p2271_p1 = scmp.ne.s32.totalorder %s2971_s1, %s2270_s21  ;;  %p2277_p13 = scmp.lt.u32.totalorder %s2270_s21, %s2971_s1 }
  0x2d   : > { %p2273_p11 = pnand %p2271_p1, %p2609_p9 }
  0x2f   : > { %p2274_p12 = pneg %p2273_p11 }
  0x31   : > { %p2279_p0 = pnand %p2277_p13, %p2274_p12 }
  0x33   : > { %2282 = shalt.err (!%p2279_p0)
}
  0x34   : > { %s2283_s19 = scalar_lea.vmem %s2597_s22, 1024  ;;  %p2291_p8 = scmp.lt.s32.totalorder %s2597_s22, %s2597_s22 }
  0x35   : > { %p2284_p2 = scmp.ne.s32.totalorder %s2597_s22, %s2283_s19  ;;  %p2292_p10 = scmp.lt.s32.totalorder %s2283_s19, %s2283_s19 }
  0x37   : > { %p2286_p3 = pnand %p2284_p2, %p2609_p9  ;;  %p2293_p1 = por %p2292_p10, %p2291_p8 }
  0x39   : > { %p2287_p6 = pneg %p2286_p3 }
  0x3b   : > { %p2294_p11 = pnand %p2293_p1, %p2287_p6 }
  0x3d   : > { %2297 = shalt.err (!%p2294_p11)
}
  0x3e   : > { %2131 = dma.hbm_to_vmem [thread:$0]  (!%p2593_p7), %s2971_s1, 1024, %s2597_s22, [#allocation9], %s2485_s25, %s2485_s25, %s2486_s26  }
  0x3f   : > { %s2298_s28 = scalar_lea.hbm %s2975_s5, 1024 }
  0x40   : > { %p2299_p12 = scmp.ne.s32.totalorder %s2975_s5, %s2298_s28  ;;  %p2305_p2 = scmp.lt.u32.totalorder %s2298_s28, %s2975_s5 }
  0x42   : > { %p2301_p13 = pnand %p2299_p12, %p2609_p9 }
  0x44   : > { %p2302_p0 = pneg %p2301_p13 }
  0x46   : > { %p2307_p3 = pnand %p2305_p2, %p2302_p0 }
  0x48   : > { %2310 = shalt.err (!%p2307_p3)
}
  0x49   : > { %s2311_s19 = scalar_lea.vmem %s310_s24, 1024  ;;  %p2319_p1 = scmp.lt.s32.totalorder %s310_s24, %s310_s24 }
  0x4a   : > { %p2312_p6 = scmp.ne.s32.totalorder %s310_s24, %s2311_s19  ;;  %p2320_p11 = scmp.lt.s32.totalorder %s2311_s19, %s2311_s19 }
  0x4c   : > { %p2314_p8 = pnand %p2312_p6, %p2609_p9  ;;  %p2321_p4 = por %p2320_p11, %p2319_p1 }
  0x4e   : > { %p2315_p10 = pneg %p2314_p8 }
  0x50   : > { %p2322_p5 = pnand %p2321_p4, %p2315_p10 }
  0x52   : > { %2325 = shalt.err (!%p2322_p5)
}
  0x53   : > { %2134 = dma.hbm_to_vmem [thread:$0]  (!%p2593_p7), %s2975_s5, 1024, %s310_s24, [#allocation9], %s2485_s25, %s2485_s25, %s2486_s26  }
  0x54   : > { %s2487_s8 = smov [#allocation12]   ;;  %s2326_s29 = scalar_lea.hbm %s2977_s7, 1024 }
  0x55   : > { %s325_s9 = sshll.u32 %s2487_s8, 4  ;;  %p2327_p4 = scmp.ne.s32.totalorder %s2977_s7, %s2326_s29  ;;  %s326_s9 = int_to_ptr.vmem [resolvable:$true] %s325_s9 }
  0x56   : > { %p2333_p13 = scmp.lt.u32.totalorder %s2326_s29, %s2977_s7 }
  0x57   : > { %p2329_p5 = pnand %p2327_p4, %p2609_p9 }
  0x59   : > { %p2330_p12 = pneg %p2329_p5 }
  0x5b   : > { %p2335_p0 = pnand %p2333_p13, %p2330_p12 }
  0x5d   : > { %2338 = shalt.err (!%p2335_p0)
}
  0x5e   : > { %s2339_s24 = scalar_lea.vmem %s326_s9, 1024  ;;  %p2347_p8 = scmp.lt.s32.totalorder %s326_s9, %s326_s9 }
  0x5f   : > { %p2340_p2 = scmp.ne.s32.totalorder %s326_s9, %s2339_s24  ;;  %p2348_p10 = scmp.lt.s32.totalorder %s2339_s24, %s2339_s24 }
  0x61   : > { %p2342_p3 = pnand %p2340_p2, %p2609_p9  ;;  %p2349_p1 = por %p2348_p10, %p2347_p8 }
  0x63   : > { %p2343_p6 = pneg %p2342_p3 }
  0x65   : > { %p2350_p11 = pnand %p2349_p1, %p2343_p6 }
  0x67   : > { %2353 = shalt.err (!%p2350_p11)
}
  0x68   : > { %2137 = dma.hbm_to_vmem [thread:$0]  (!%p2593_p7), %s2977_s7, 1024, %s326_s9, [#allocation13], %s2485_s25, %s2485_s25, %s2486_s26  }
  0x69   : > { %s35_s30 = sadd.s32 1, %s2476_s13  ;;  %s89_s20 = sadd.s32 1, %s2468_s11 }
  0x6a   : > { %p37_p9 = scmp.ge.s32.totalorder %s35_s30, 3  ;;  %p96_p4 = scmp.ne.s32.totalorder %s2468_s11, %s2464_s10 }
  0x6b   : > { %p97_p5 = scmp.eq.s32.totalorder %s2480_s14, 0  ;;  %p2146_p12 = scmp.lt.s32.totalorder %s2480_s14, 3 }
  0x6c   : > { %s3012_s30 = smov (%p37_p9, %s35_s30), 0  ;;  %s342_s8 = sand.u32 1, %s2480_s14  }
  0x6d   : > { %p98_p13 = por %p97_p5, %p96_p4  ;;  %s86_s27 = ssub.s32 %s2476_s13, %s3012_s30 }
  0x6e   : > { %p87_p0 = scmp.eq.s32.totalorder %s86_s27, 0  ;;  %s344_s28 = sand.u32 1, %s2468_s11  }
  0x6f   : > { %s1677_s29 = sshll.u32 %s344_s28, 6  ;;  %s1758_s18 = sshll.u32 %s2476_s13, 10 }
  0x70   : > { %s2716_s21 = scalar_select %p87_p0, %s2468_s11, %s89_s20  }
  0x71   : > { %s2721_s19 = scalar_lea.hbm %s2972_s2, %s1758_s18  ;;  %s346_s24 = scalar_lea.vmem [#allocation10], %s1677_s29 }
  0x72   : > { %s353_s22 = sshll.u32 %s346_s24, 4  ;;  %p2725_p7 = pnand %p2146_p12, %p98_p13  ;;  %s2729_s22 = int_to_ptr.vmem [resolvable:$true] %s353_s22 }
  0x73   : > { %s2731_s20 = scalar_lea.sflag [#allocation6], %s342_s8  ;;  %s2354_s27 = scalar_lea.hbm %s2721_s19, 1024 }
  0x74   : > { %p2355_p2 = scmp.ne.s32.totalorder %s2721_s19, %s2354_s27  ;;  %p2356_p3 = pneg %p2725_p7 }
  0x75   : > { %s2359_s18 = scalar_lea.hbm %s2972_s2, 3072  ;;  %p2360_p10 = scmp.lt.u32.totalorder %s2721_s19, %s2972_s2 }
  0x76   : > { %p2357_p6 = pnand %p2356_p3, %p2355_p2  ;;  %p2361_p1 = scmp.lt.u32.totalorder %s2359_s18, %s2354_s27 }
  0x77   : > { %p2363_p9 = scmp.lt.u32.totalorder %s2354_s27, %s2721_s19 }
  0x78   : > { %p2358_p8 = pneg %p2357_p6  ;;  %p2362_p11 = por %p2361_p1, %p2360_p10 }
  0x7a   : > { %p2364_p4 = por %p2363_p9, %p2362_p11 }
  0x7c   : > { %p2365_p5 = pnand %p2364_p4, %p2358_p8 }
  0x7e   : > { %2368 = shalt.err (!%p2365_p5)
}
  0x7f   : > { %s2369_s8 = scalar_lea.vmem %s2729_s22, 1024  ;;  %s2488_s24 = smov [#allocation10]  }
  0x80   : > { %p2370_p12 = scmp.ne.s32.totalorder %s2729_s22, %s2369_s8  ;;  %s2374_s28 = sshll.u32 %s2488_s24, 4  ;;  %s2375_s28 = int_to_ptr.vmem [resolvable:$false] %s2374_s28 }
  0x81   : > { %s2376_s29 = scalar_lea.vmem %s2375_s28, 2048  ;;  %p2377_p2 = scmp.lt.s32.totalorder %s2729_s22, %s2375_s28 }
  0x82   : > { %p2372_p13 = pnand %p2370_p12, %p2356_p3  ;;  %p2378_p6 = scmp.lt.s32.totalorder %s2376_s29, %s2369_s8 }
  0x84   : > { %p2373_p0 = pneg %p2372_p13  ;;  %p2379_p10 = por %p2378_p6, %p2377_p2 }
  0x86   : > { %p2380_p1 = pnand %p2379_p10, %p2373_p0 }
  0x88   : > { %2383 = shalt.err (!%p2380_p1)
}
  0x89   : > { %2141 = dma.hbm_to_vmem [thread:$0]  (!%p2725_p7), %s2721_s19, 1024, %s2729_s22, %s2731_s20, %s2485_s25, %s2485_s25, %s2486_s26  }
  0x8a   : > { %p2992_p3 = scmp.ne.s32.totalorder %s2988_s17, 0 }
  0x8b   : > { %p2993_p8 = scmp.eq.s32.totalorder (!%p2992_p3), %s2571_s15, 0 }
  0x8c   : > { %371 = sbr.rel (%p2992_p3) target bundleno = 1931 (0x78b), region = 56 }
  0x93   : > { %2435 = dma.done.wait (%p2993_p8), [#allocation6], 1024   ;;  %p2994_p11 = pmov %p2993_p8 }
  0x94   : > { %p2995_p9 = pmov %p2993_p8 }
  0x95   : > { %2437 = vsyncadd (%p2994_p11), [#allocation6], 4294966272 }
  0x96   : > { %2439 = dma.done.wait (%p2995_p9), [#allocation9], 1024   ;;  %p2996_p4 = pmov %p2993_p8 }
  0x97   : > { %s381_s6 = sand.u32 1, %s2571_s15   ;;  %s383_s25 = sand.u32 1, %s2464_s10  }
  0x98   : > { %2441 = vsyncadd (%p2996_p4), [#allocation9], 4294966272  ;;  %s1683_s26 = sshll.u32 %s383_s25, 6  ;;  %s382_s17 = scalar_lea.sflag [#allocation6], %s381_s6 }
  0x99   : > { %s385_s19 = scalar_lea.vmem [#allocation10], %s1683_s26  ;;  %p2997_p7 = scmp.ne.s32.totalorder %s2987_s16, 0 }
  0x9b   : > { %2443 = dma.done.wait (%p2997_p7), %s382_s17, 1024  }
  0x9c   : > { %2445 = vsyncadd (%p2997_p7), %s382_s17, 4294966272  ;;  %p2998_p5 = pmov %p2996_p4 }
  0x9d   : > { %p2999_p12 = pmov %p2996_p4 }
  0x9e   : > { %2447 = dma.done.wait (%p2998_p5), [#allocation9], 1024  }
  0x9f   : > { %2449 = vsyncadd (%p2999_p12), [#allocation9], 4294966272  ;;  %p3000_p13 = pmov %p2996_p4 }
  0xa0   : > { %p3001_p0 = pmov %p2996_p4 }
  0xa1   : > { %2451 = dma.done.wait (%p3000_p13), [#allocation13], 1024  }
  0xa2   : > { %2453 = vsyncadd (%p3001_p0), [#allocation13], 4294966272  ;;  %p427_p2 = scmp.lt.s32.totalorder %s2472_s12, 2  ;;  %v2794_v0 = vld [vmem:[%s385_s19] sm:$0xf]  ;;  %p1686_p6 = scmp.ne.s32.totalorder %s2472_s12, 0 }
  0xa3   : > { %v2796_v1 = vld [vmem:[%s385_s19 + $0x4] sm:$0xf]  ;;  %v2798_v2 = vld [vmem:[%s385_s19 + $0x8] sm:$0xf]  ;;  %v2800_v3 = vld [vmem:[%s385_s19 + $0xc] sm:$0xf] }
  0xa4   : > { %s2788_s22 = scalar_select %p427_p2, %s2472_s12, 2  ;;  %v2802_v4 = vld [vmem:[%s385_s19 + $0x10] sm:$0xf]  ;;  %v2804_v5 = vld [vmem:[%s385_s19 + $0x14] sm:$0xf] }
  0xa5   : > { %v2806_v6 = vld [vmem:[%s385_s19 + $0x18] sm:$0xf]  ;;  %v2808_v7 = vld [vmem:[%s385_s19 + $0x1c] sm:$0xf]  ;;  %v2810_v8 = vld [vmem:[%s385_s19 + $0x20] sm:$0xf]  ;;  %v1695_v16 = vcombine.low (!%p1686_p6), %v2794_v0, %v2796_v1  ;;  %v1696_v17 = vcombine.low (!%p1686_p6), %v2798_v2, %v2800_v3  ;;  %v1697_v20 = vcombine.low (!%p1686_p6), %v2802_v4, %v2804_v5 }
  0xa6   : > { %s429_s27 = scalar_lea.vmem %s2973_s3, %s2788_s22  ;;  %v2812_v9 = vld [vmem:[%s385_s19 + $0x24] sm:$0xf]  ;;  %v2814_v10 = vld [vmem:[%s385_s19 + $0x28] sm:$0xf]  ;;  %v2816_v11 = vld [vmem:[%s385_s19 + $0x2c] sm:$0xf]  ;;  %v1698_v21 = vcombine.low (!%p1686_p6), %v2806_v6, %v2808_v7 }
  0xa7   : > { %v2818_v12 = vld [vmem:[%s385_s19 + $0x30] sm:$0xf]  ;;  %v2820_v13 = vld [vmem:[%s385_s19 + $0x34] sm:$0xf]  ;;  %v2822_v14 = vld [vmem:[%s385_s19 + $0x38] sm:$0xf]  ;;  %1851 = vmatprep.subr.bf16.mxu0 (!%p1686_p6), %v1695_v16  ;;  %2039 = vmatprep.subr.bf16.mxu1 (!%p1686_p6), %v1695_v16  ;;  %v1699_v22 = vcombine.low (!%p1686_p6), %v2810_v8, %v2812_v9  ;;  %v1700_v23 = vcombine.low (!%p1686_p6), %v2814_v10, %v2816_v11 }
  0xa8   : > { %v2824_v15 = vld [vmem:[%s385_s19 + $0x3c] sm:$0xf]  ;;  %454 = sbr.rel (%p1686_p6) target bundleno = 425 (0x1a9), region = 84  ;;  %v2210_v18 = vld [vmem:[#allocation8] sm:$0xff] (!%p1686_p6)   ;;  %1852 = vmatpush3.bf16.msra.mxu0 (!%p1686_p6), %v1695_v16  ;;  %2047 = vmatpush3.bf16.msra.mxu1 (!%p1686_p6), %v1695_v16  ;;  %v1701_v24 = vcombine.low (!%p1686_p6), %v2818_v12, %v2820_v13  ;;  %v2212_v26 = vld [vmem:[#allocation8 + $0x8] sm:$0xff] (!%p1686_p6)  }
  0xa9   : > { %v2211_v19 = vld [vmem:[#allocation8 + $0x20] sm:$0xff] (!%p1686_p6)   ;;  %1853 = vmatprep.subr.bf16.mxu0 (!%p1686_p6), %v1696_v17  ;;  %2040 = vmatprep.subr.bf16.mxu1 (!%p1686_p6), %v1696_v17  ;;  %v1702_v25 = vcombine.low (!%p1686_p6), %v2822_v14, %v2824_v15  ;;  %v2213_v27 = vld [vmem:[#allocation8 + $0x28] sm:$0xff] (!%p1686_p6)   ;;  %v2214_v28 = vld [vmem:[#allocation8 + $0x10] sm:$0xff] (!%p1686_p6)  }
  0xaa   : > { %1867 = vmatprep.mubr.bf16.mxu0 (!%p1686_p6), %v2210_v18  ;;  %1875 = vmatprep.mubr.bf16.mxu1 (!%p1686_p6), %v2211_v19  ;;  %v2215_v29 = vld [vmem:[#allocation8 + $0x30] sm:$0xff] (!%p1686_p6)   ;;  %v2216_v30 = vld [vmem:[#allocation8 + $0x18] sm:$0xff] (!%p1686_p6)  }
  0xab   : > { %v2217_v31 = vld [vmem:[#allocation8 + $0x38] sm:$0xff] (!%p1686_p6)  }
  0xac   : > { %1854 = vmatpush3.bf16.msra.mxu0 (!%p1686_p6), %v1696_v17  ;;  %2048 = vmatpush3.bf16.msra.mxu1 (!%p1686_p6), %v1696_v17 }
  0xad   : > { %1855 = vmatprep.subr.bf16.mxu0 (!%p1686_p6), %v1697_v20  ;;  %2041 = vmatprep.subr.bf16.mxu1 (!%p1686_p6), %v1697_v20 }
  0xb0   : > { %1856 = vmatpush3.bf16.msra.mxu0 %v1697_v20  ;;  %2049 = vmatpush3.bf16.msra.mxu1 %v1697_v20 }
  0xb1   : > { %1857 = vmatprep.subr.bf16.mxu0 %v1698_v21  ;;  %2042 = vmatprep.subr.bf16.mxu1 %v1698_v21 }
  0xb4   : > { %1858 = vmatpush3.bf16.msra.mxu0 %v1698_v21  ;;  %2050 = vmatpush3.bf16.msra.mxu1 %v1698_v21 }
  0xb5   : > { %1859 = vmatprep.subr.bf16.mxu0 %v1699_v22  ;;  %2043 = vmatprep.subr.bf16.mxu1 %v1699_v22 }
  0xb8   : > { %1860 = vmatpush3.bf16.msra.mxu0 %v1699_v22  ;;  %2051 = vmatpush3.bf16.msra.mxu1 %v1699_v22 }
  0xb9   : > { %1861 = vmatprep.subr.bf16.mxu0 %v1700_v23  ;;  %2044 = vmatprep.subr.bf16.mxu1 %v1700_v23 }
  0xbc   : > { %1862 = vmatpush3.bf16.msra.mxu0 %v1700_v23  ;;  %2052 = vmatpush3.bf16.msra.mxu1 %v1700_v23 }
  0xbd   : > { %1863 = vmatprep.subr.bf16.mxu0 %v1701_v24  ;;  %2045 = vmatprep.subr.bf16.mxu1 %v1701_v24 }
  0xc0   : > { %1864 = vmatpush3.bf16.msra.mxu0 %v1701_v24  ;;  %2053 = vmatpush3.bf16.msra.mxu1 %v1701_v24 }
  0xc1   : > { %1865 = vmatprep.subr.bf16.mxu0 %v1702_v25  ;;  %2046 = vmatprep.subr.bf16.mxu1 %v1702_v25 }
  0xc4   : > { %1866 = vmatpush3.bf16.msra.mxu0 %v1702_v25  ;;  %2054 = vmatpush3.bf16.msra.mxu1 %v1702_v25 }
  0xc7   : > { %1868 = vmatmul.mubr.bf16.vlgmr.msra.gmra.mrb[0].mxu0 %v2212_v26  ;;  %1876 = vmatmul.mubr.bf16.vlgmr.msra.gmra.mrb[0].mxu1 %v2213_v27 }
  0xc8   : > { %1871 = vmatprep.mubr.bf16.mxu0 %v2214_v28  ;;  %1879 = vmatprep.mubr.bf16.mxu1 %v2215_v29 }
  0xcf   : > { %1872 = vmatmul.mubr.bf16.gmra.mrb[4].mxu0 %v2216_v30  ;;  %1880 = vmatmul.mubr.bf16.gmra.mrb[4].mxu1 %v2217_v31 }
 0x19a   : > { %v1869_v32 = vpop.f32.mrb[0].mxu0  ;;  %v1877_v33 = vpop.f32.mrb[0].mxu1 }
 0x19b   : > { %v601_v34 = vpop.f32.mrb[1].mxu0  ;;  %v633_v35 = vpop.f32.mrb[1].mxu1 }
 0x19c   : > { %v1870_v36 = vpop.f32.mrb[2].mxu0  ;;  %v1878_v37 = vpop.f32.mrb[2].mxu1 }
 0x19d   : > { %v665_v38 = vpack.c.bf16 %v1870_v36, %v1869_v32  ;;  %v669_v39 = vpack.c.bf16 %v1878_v37, %v1877_v33  ;;  %v604_v40 = vpop.f32.mrb[3].mxu0  ;;  %v636_v41 = vpop.f32.mrb[3].mxu1 }
 0x19e   : > { %v664_v42 = vpack.c.bf16 %v604_v40, %v601_v34  ;;  %v668_v43 = vpack.c.bf16 %v636_v41, %v633_v35 }
 0x19f   : > { %673 = vst [vmem:[#allocation2 + $0x8] sm:$0xff] %v665_v38  ;;  %677 = vst [vmem:[#allocation2 + $0x28] sm:$0xff] %v669_v39 }
 0x1a0   : > { %672 = vst [vmem:[#allocation2] sm:$0xff] %v664_v42  ;;  %676 = vst [vmem:[#allocation2 + $0x20] sm:$0xff] %v668_v43 }
 0x1a2   : > { %v1873_v44 = vpop.f32.mrb[4].mxu0  ;;  %v1881_v45 = vpop.f32.mrb[4].mxu1 }
 0x1a3   : > { %v617_v46 = vpop.f32.mrb[5].mxu0  ;;  %v649_v47 = vpop.f32.mrb[5].mxu1 }
 0x1a4   : > { %v1874_v48 = vpop.f32.mrb[6].mxu0  ;;  %v1882_v49 = vpop.f32.mrb[6].mxu1 }
 0x1a5   : > { %v667_v50 = vpack.c.bf16 %v1874_v48, %v1873_v44  ;;  %v671_v51 = vpack.c.bf16 %v1882_v49, %v1881_v45  ;;  %v620_v52 = vpop.f32.mrb[7].mxu0  ;;  %v652_v53 = vpop.f32.mrb[7].mxu1 }
 0x1a6   : > { %v666_v54 = vpack.c.bf16 %v620_v52, %v617_v46  ;;  %v670_v55 = vpack.c.bf16 %v652_v53, %v649_v47 }
 0x1a7   : > { %675 = vst [vmem:[#allocation2 + $0x18] sm:$0xff] %v667_v50  ;;  %679 = vst [vmem:[#allocation2 + $0x38] sm:$0xff] %v671_v51 }
 0x1a8   : > { %674 = vst [vmem:[#allocation2 + $0x10] sm:$0xff] %v666_v54  ;;  %678 = vst [vmem:[#allocation2 + $0x30] sm:$0xff] %v670_v55 }
 0x1a9 PF: > { %p1703_p10 = scmp.ne.s32.totalorder %s2472_s12, 1 }
 0x1aa   : > { %v1704_v56 = vcombine.low (!%p1703_p10), %v2794_v0, %v2796_v1  ;;  %v1705_v57 = vcombine.low (!%p1703_p10), %v2798_v2, %v2800_v3  ;;  %v684_v58 = vld [vmem:[#allocation3] sm:$0xff] (!%p1703_p10)  ;;  %v1706_v60 = vcombine.low (!%p1703_p10), %v2802_v4, %v2804_v5  ;;  %v1707_v61 = vcombine.low (!%p1703_p10), %v2806_v6, %v2808_v7  ;;  %v685_v18 = vld [vmem:[#allocation3 + $0x8] sm:$0xff] (!%p1703_p10)  ;;  %v686_v20 = vld [vmem:[#allocation3 + $0x10] sm:$0xff] (!%p1703_p10) }
 0x1ab   : > { %683 = sbr.rel (%p1703_p10) target bundleno = 686 (0x2ae), region = 88  ;;  %1899 = vmatprep.mubr.bf16.mxu0 (!%p1703_p10), %v684_v58  ;;  %v688_v59 = vld [vmem:[#allocation3 + $0x20] sm:$0xff] (!%p1703_p10)  ;;  %v1708_v62 = vcombine.low (!%p1703_p10), %v2810_v8, %v2812_v9  ;;  %v1709_v63 = vcombine.low (!%p1703_p10), %v2814_v10, %v2816_v11  ;;  %v1710_v16 = vcombine.low (!%p1703_p10), %v2818_v12, %v2820_v13  ;;  %v1711_v17 = vcombine.low (!%p1703_p10), %v2822_v14, %v2824_v15  ;;  %v689_v19 = vld [vmem:[#allocation3 + $0x28] sm:$0xff] (!%p1703_p10)  ;;  %v690_v21 = vld [vmem:[#allocation3 + $0x30] sm:$0xff] (!%p1703_p10) }
 0x1ac   : > { %1883 = vmatprep.subr.bf16.mxu0 (!%p1703_p10), %v1704_v56  ;;  %2055 = vmatprep.subr.bf16.mxu1 (!%p1703_p10), %v1704_v56  ;;  %v687_v22 = vld [vmem:[#allocation3 + $0x18] sm:$0xff] (!%p1703_p10) }
 0x1ad   : > { %1884 = vmatpush3.bf16.msra.mxu0 (!%p1703_p10), %v1704_v56  ;;  %2063 = vmatpush3.bf16.msra.mxu1 (!%p1703_p10), %v1704_v56  ;;  %v691_v23 = vld [vmem:[#allocation3 + $0x38] sm:$0xff] (!%p1703_p10) }
 0x1ae   : > { %1885 = vmatprep.subr.bf16.mxu0 (!%p1703_p10), %v1705_v57  ;;  %2056 = vmatprep.subr.bf16.mxu1 (!%p1703_p10), %v1705_v57 }
 0x1af   : > { %1907 = vmatprep.mubr.bf16.mxu1 (!%p1703_p10), %v688_v59 }
 0x1b1   : > { %1886 = vmatpush3.bf16.msra.mxu0 (!%p1703_p10), %v1705_v57  ;;  %2064 = vmatpush3.bf16.msra.mxu1 (!%p1703_p10), %v1705_v57 }
 0x1b2   : > { %1887 = vmatprep.subr.bf16.mxu0 %v1706_v60  ;;  %2057 = vmatprep.subr.bf16.mxu1 %v1706_v60 }
 0x1b5   : > { %1888 = vmatpush3.bf16.msra.mxu0 %v1706_v60  ;;  %2065 = vmatpush3.bf16.msra.mxu1 %v1706_v60 }
 0x1b6   : > { %1889 = vmatprep.subr.bf16.mxu0 %v1707_v61  ;;  %2058 = vmatprep.subr.bf16.mxu1 %v1707_v61 }
 0x1b9   : > { %1890 = vmatpush3.bf16.msra.mxu0 %v1707_v61  ;;  %2066 = vmatpush3.bf16.msra.mxu1 %v1707_v61 }
 0x1ba   : > { %1891 = vmatprep.subr.bf16.mxu0 %v1708_v62  ;;  %2059 = vmatprep.subr.bf16.mxu1 %v1708_v62 }
 0x1bd   : > { %1892 = vmatpush3.bf16.msra.mxu0 %v1708_v62  ;;  %2067 = vmatpush3.bf16.msra.mxu1 %v1708_v62 }
 0x1be   : > { %1893 = vmatprep.subr.bf16.mxu0 %v1709_v63  ;;  %2060 = vmatprep.subr.bf16.mxu1 %v1709_v63 }
 0x1c1   : > { %1894 = vmatpush3.bf16.msra.mxu0 %v1709_v63  ;;  %2068 = vmatpush3.bf16.msra.mxu1 %v1709_v63 }
 0x1c2   : > { %1895 = vmatprep.subr.bf16.mxu0 %v1710_v16  ;;  %2061 = vmatprep.subr.bf16.mxu1 %v1710_v16 }
 0x1c5   : > { %1896 = vmatpush3.bf16.msra.mxu0 %v1710_v16  ;;  %2069 = vmatpush3.bf16.msra.mxu1 %v1710_v16 }
 0x1c6   : > { %1897 = vmatprep.subr.bf16.mxu0 %v1711_v17  ;;  %2062 = vmatprep.subr.bf16.mxu1 %v1711_v17 }
 0x1c9   : > { %1898 = vmatpush3.bf16.msra.mxu0 %v1711_v17  ;;  %2070 = vmatpush3.bf16.msra.mxu1 %v1711_v17 }
 0x1cc   : > { %1900 = vmatmul.mubr.bf16.vlgmr.msra.gmra.mrb[0].mxu0 %v685_v18  ;;  %1908 = vmatmul.mubr.bf16.vlgmr.msra.gmra.mrb[0].mxu1 %v689_v19 }
 0x1cd   : > { %1903 = vmatprep.mubr.bf16.mxu0 %v686_v20  ;;  %1911 = vmatprep.mubr.bf16.mxu1 %v690_v21 }
 0x1d4   : > { %1904 = vmatmul.mubr.bf16.gmra.mrb[4].mxu0 %v687_v22  ;;  %1912 = vmatmul.mubr.bf16.gmra.mrb[4].mxu1 %v691_v23 }
 0x29f   : > { %v1901_v24 = vpop.f32.mrb[0].mxu0  ;;  %v1909_v25 = vpop.f32.mrb[0].mxu1 }
 0x2a0   : > { %v774_v26 = vpop.f32.mrb[1].mxu0  ;;  %v806_v27 = vpop.f32.mrb[1].mxu1 }
 0x2a1   : > { %v1902_v28 = vpop.f32.mrb[2].mxu0  ;;  %v1910_v29 = vpop.f32.mrb[2].mxu1 }
 0x2a2   : > { %v838_v30 = vpack.c.bf16 %v1902_v28, %v1901_v24  ;;  %v842_v31 = vpack.c.bf16 %v1910_v29, %v1909_v25  ;;  %v777_v32 = vpop.f32.mrb[3].mxu0  ;;  %v809_v33 = vpop.f32.mrb[3].mxu1 }
 0x2a3   : > { %v837_v34 = vpack.c.bf16 %v777_v32, %v774_v26  ;;  %v841_v35 = vpack.c.bf16 %v809_v33, %v806_v27 }
 0x2a4   : > { %846 = vst [vmem:[#allocation2 + $0x8] sm:$0xff] %v838_v30  ;;  %850 = vst [vmem:[#allocation2 + $0x28] sm:$0xff] %v842_v31 }
 0x2a5   : > { %845 = vst [vmem:[#allocation2] sm:$0xff] %v837_v34  ;;  %849 = vst [vmem:[#allocation2 + $0x20] sm:$0xff] %v841_v35 }
 0x2a7   : > { %v1905_v36 = vpop.f32.mrb[4].mxu0  ;;  %v1913_v37 = vpop.f32.mrb[4].mxu1 }
 0x2a8   : > { %v790_v38 = vpop.f32.mrb[5].mxu0  ;;  %v822_v39 = vpop.f32.mrb[5].mxu1 }
 0x2a9   : > { %v1906_v40 = vpop.f32.mrb[6].mxu0  ;;  %v1914_v41 = vpop.f32.mrb[6].mxu1 }
 0x2aa   : > { %v840_v42 = vpack.c.bf16 %v1906_v40, %v1905_v36  ;;  %v844_v43 = vpack.c.bf16 %v1914_v41, %v1913_v37  ;;  %v793_v44 = vpop.f32.mrb[7].mxu0  ;;  %v825_v45 = vpop.f32.mrb[7].mxu1 }
 0x2ab   : > { %v839_v46 = vpack.c.bf16 %v793_v44, %v790_v38  ;;  %v843_v47 = vpack.c.bf16 %v825_v45, %v822_v39 }
 0x2ac   : > { %848 = vst [vmem:[#allocation2 + $0x18] sm:$0xff] %v840_v42  ;;  %852 = vst [vmem:[#allocation2 + $0x38] sm:$0xff] %v844_v43 }
 0x2ad   : > { %847 = vst [vmem:[#allocation2 + $0x10] sm:$0xff] %v839_v46  ;;  %851 = vst [vmem:[#allocation2 + $0x30] sm:$0xff] %v843_v47 }
 0x2ae PF: > { %p1712_p1 = scmp.ne.s32.totalorder %s2472_s12, 2 }
 0x2af   : > { %v1713_v48 = vcombine.low (!%p1712_p1), %v2794_v0, %v2796_v1  ;;  %v1714_v49 = vcombine.low (!%p1712_p1), %v2798_v2, %v2800_v3  ;;  %v857_v50 = vld [vmem:[#allocation4] sm:$0xff] (!%p1712_p1)  ;;  %v1715_v52 = vcombine.low (!%p1712_p1), %v2802_v4, %v2804_v5  ;;  %v1716_v0 = vcombine.low (!%p1712_p1), %v2806_v6, %v2808_v7  ;;  %v858_v5 = vld [vmem:[#allocation4 + $0x8] sm:$0xff] (!%p1712_p1)  ;;  %v859_v7 = vld [vmem:[#allocation4 + $0x10] sm:$0xff] (!%p1712_p1) }
 0x2b0   : > { %856 = sbr.rel (%p1712_p1) target bundleno = 947 (0x3b3), region = 92  ;;  %1931 = vmatprep.mubr.bf16.mxu0 (!%p1712_p1), %v857_v50  ;;  %v861_v51 = vld [vmem:[#allocation4 + $0x20] sm:$0xff] (!%p1712_p1)  ;;  %v1717_v1 = vcombine.low (!%p1712_p1), %v2810_v8, %v2812_v9  ;;  %v1718_v2 = vcombine.low (!%p1712_p1), %v2814_v10, %v2816_v11  ;;  %v1719_v3 = vcombine.low (!%p1712_p1), %v2818_v12, %v2820_v13  ;;  %v1720_v4 = vcombine.low (!%p1712_p1), %v2822_v14, %v2824_v15  ;;  %v862_v6 = vld [vmem:[#allocation4 + $0x28] sm:$0xff] (!%p1712_p1)  ;;  %v863_v8 = vld [vmem:[#allocation4 + $0x30] sm:$0xff] (!%p1712_p1) }
 0x2b1   : > { %1915 = vmatprep.subr.bf16.mxu0 (!%p1712_p1), %v1713_v48  ;;  %2071 = vmatprep.subr.bf16.mxu1 (!%p1712_p1), %v1713_v48  ;;  %v860_v9 = vld [vmem:[#allocation4 + $0x18] sm:$0xff] (!%p1712_p1) }
 0x2b2   : > { %1916 = vmatpush3.bf16.msra.mxu0 (!%p1712_p1), %v1713_v48  ;;  %2079 = vmatpush3.bf16.msra.mxu1 (!%p1712_p1), %v1713_v48  ;;  %v864_v10 = vld [vmem:[#allocation4 + $0x38] sm:$0xff] (!%p1712_p1) }
 0x2b3   : > { %1917 = vmatprep.subr.bf16.mxu0 (!%p1712_p1), %v1714_v49  ;;  %2072 = vmatprep.subr.bf16.mxu1 (!%p1712_p1), %v1714_v49 }
 0x2b4   : > { %1939 = vmatprep.mubr.bf16.mxu1 (!%p1712_p1), %v861_v51 }
 0x2b6   : > { %1918 = vmatpush3.bf16.msra.mxu0 (!%p1712_p1), %v1714_v49  ;;  %2080 = vmatpush3.bf16.msra.mxu1 (!%p1712_p1), %v1714_v49 }
 0x2b7   : > { %1919 = vmatprep.subr.bf16.mxu0 %v1715_v52  ;;  %2073 = vmatprep.subr.bf16.mxu1 %v1715_v52 }
 0x2ba   : > { %1920 = vmatpush3.bf16.msra.mxu0 %v1715_v52  ;;  %2081 = vmatpush3.bf16.msra.mxu1 %v1715_v52 }
 0x2bb   : > { %1921 = vmatprep.subr.bf16.mxu0 %v1716_v0  ;;  %2074 = vmatprep.subr.bf16.mxu1 %v1716_v0 }
 0x2be   : > { %1922 = vmatpush3.bf16.msra.mxu0 %v1716_v0  ;;  %2082 = vmatpush3.bf16.msra.mxu1 %v1716_v0 }
 0x2bf   : > { %1923 = vmatprep.subr.bf16.mxu0 %v1717_v1  ;;  %2075 = vmatprep.subr.bf16.mxu1 %v1717_v1 }
 0x2c2   : > { %1924 = vmatpush3.bf16.msra.mxu0 %v1717_v1  ;;  %2083 = vmatpush3.bf16.msra.mxu1 %v1717_v1 }
 0x2c3   : > { %1925 = vmatprep.subr.bf16.mxu0 %v1718_v2  ;;  %2076 = vmatprep.subr.bf16.mxu1 %v1718_v2 }
 0x2c6   : > { %1926 = vmatpush3.bf16.msra.mxu0 %v1718_v2  ;;  %2084 = vmatpush3.bf16.msra.mxu1 %v1718_v2 }
 0x2c7   : > { %1927 = vmatprep.subr.bf16.mxu0 %v1719_v3  ;;  %2077 = vmatprep.subr.bf16.mxu1 %v1719_v3 }
 0x2ca   : > { %1928 = vmatpush3.bf16.msra.mxu0 %v1719_v3  ;;  %2085 = vmatpush3.bf16.msra.mxu1 %v1719_v3 }
 0x2cb   : > { %1929 = vmatprep.subr.bf16.mxu0 %v1720_v4  ;;  %2078 = vmatprep.subr.bf16.mxu1 %v1720_v4 }
 0x2ce   : > { %1930 = vmatpush3.bf16.msra.mxu0 %v1720_v4  ;;  %2086 = vmatpush3.bf16.msra.mxu1 %v1720_v4 }
 0x2d1   : > { %1932 = vmatmul.mubr.bf16.vlgmr.msra.gmra.mrb[0].mxu0 %v858_v5  ;;  %1940 = vmatmul.mubr.bf16.vlgmr.msra.gmra.mrb[0].mxu1 %v862_v6 }
 0x2d2   : > { %1935 = vmatprep.mubr.bf16.mxu0 %v859_v7  ;;  %1943 = vmatprep.mubr.bf16.mxu1 %v863_v8 }
 0x2d9   : > { %1936 = vmatmul.mubr.bf16.gmra.mrb[4].mxu0 %v860_v9  ;;  %1944 = vmatmul.mubr.bf16.gmra.mrb[4].mxu1 %v864_v10 }
 0x3a4   : > { %v1933_v11 = vpop.f32.mrb[0].mxu0  ;;  %v1941_v12 = vpop.f32.mrb[0].mxu1 }
 0x3a5   : > { %v947_v13 = vpop.f32.mrb[1].mxu0  ;;  %v979_v14 = vpop.f32.mrb[1].mxu1 }
 0x3a6   : > { %v1934_v15 = vpop.f32.mrb[2].mxu0  ;;  %v1942_v53 = vpop.f32.mrb[2].mxu1 }
 0x3a7   : > { %v1011_v54 = vpack.c.bf16 %v1934_v15, %v1933_v11  ;;  %v1015_v55 = vpack.c.bf16 %v1942_v53, %v1941_v12  ;;  %v950_v56 = vpop.f32.mrb[3].mxu0  ;;  %v982_v57 = vpop.f32.mrb[3].mxu1 }
 0x3a8   : > { %v1010_v58 = vpack.c.bf16 %v950_v56, %v947_v13  ;;  %v1014_v59 = vpack.c.bf16 %v982_v57, %v979_v14 }
 0x3a9   : > { %1019 = vst [vmem:[#allocation2 + $0x8] sm:$0xff] %v1011_v54  ;;  %1023 = vst [vmem:[#allocation2 + $0x28] sm:$0xff] %v1015_v55 }
 0x3aa   : > { %1018 = vst [vmem:[#allocation2] sm:$0xff] %v1010_v58  ;;  %1022 = vst [vmem:[#allocation2 + $0x20] sm:$0xff] %v1014_v59 }
 0x3ac   : > { %v1937_v60 = vpop.f32.mrb[4].mxu0  ;;  %v1945_v61 = vpop.f32.mrb[4].mxu1 }
 0x3ad   : > { %v963_v62 = vpop.f32.mrb[5].mxu0  ;;  %v995_v63 = vpop.f32.mrb[5].mxu1 }
 0x3ae   : > { %v1938_v16 = vpop.f32.mrb[6].mxu0  ;;  %v1946_v17 = vpop.f32.mrb[6].mxu1 }
 0x3af   : > { %v1013_v18 = vpack.c.bf16 %v1938_v16, %v1937_v60  ;;  %v1017_v19 = vpack.c.bf16 %v1946_v17, %v1945_v61  ;;  %v966_v20 = vpop.f32.mrb[7].mxu0  ;;  %v998_v21 = vpop.f32.mrb[7].mxu1 }
 0x3b0   : > { %v1012_v22 = vpack.c.bf16 %v966_v20, %v963_v62  ;;  %v1016_v23 = vpack.c.bf16 %v998_v21, %v995_v63 }
 0x3b1   : > { %1021 = vst [vmem:[#allocation2 + $0x18] sm:$0xff] %v1013_v18  ;;  %1025 = vst [vmem:[#allocation2 + $0x38] sm:$0xff] %v1017_v19 }
 0x3b2   : > { %1020 = vst [vmem:[#allocation2 + $0x10] sm:$0xff] %v1012_v22  ;;  %1024 = vst [vmem:[#allocation2 + $0x30] sm:$0xff] %v1016_v23 }
 0x3b3 PF: > { %v1042_v24 = vld [vmem:[#allocation2] sm:$0xff]  ;;  %v1043_v25 = vld [vmem:[#allocation2 + $0x8] sm:$0xff]  ;;  %v2222_v36 = vld [vmem:[#allocation5 + $0x10] sm:$0xff]   ;;  %s1228_s18 = ssub.s32 0, %s2472_s12  ;;  %p1227_p3 = scmp.lt.s32.totalorder %s2472_s12, 0 }
 0x3b4   : > { %1947 = vmatprep.subr.bf16.mxu0 %v1042_v24  ;;  %2087 = vmatprep.subr.bf16.mxu1 %v1042_v24  ;;  %v2218_v27 = vld [vmem:[#allocation5] sm:$0xff]   ;;  %v1047_v31 = vld [vmem:[#allocation2 + $0x28] sm:$0xff]  ;;  %v2223_v37 = vld [vmem:[#allocation5 + $0x30] sm:$0xff]   ;;  %s1730_s9 = smin.u32 %s2472_s12, %s1228_s18 }
 0x3b5   : > { %1948 = vmatpush3.bf16.msra.mxu0 %v1042_v24  ;;  %2095 = vmatpush3.bf16.msra.mxu1 %v1042_v24  ;;  %v2219_v28 = vld [vmem:[#allocation5 + $0x20] sm:$0xff]   ;;  %v2220_v34 = vld [vmem:[#allocation5 + $0x8] sm:$0xff]   ;;  %v2224_v38 = vld [vmem:[#allocation5 + $0x18] sm:$0xff]   ;;  %s1230_s23 = sand.u32 1, %s1730_s9  }
 0x3b6   : > { %1949 = vmatprep.subr.bf16.mxu0 %v1043_v25  ;;  %2088 = vmatprep.subr.bf16.mxu1 %v1043_v25  ;;  %v1046_v30 = vld [vmem:[#allocation2 + $0x20] sm:$0xff]  ;;  %v2221_v35 = vld [vmem:[#allocation5 + $0x28] sm:$0xff]   ;;  %v2225_v39 = vld [vmem:[#allocation5 + $0x38] sm:$0xff]   ;;  %s1231_s8 = ssub.s32 0, %s1230_s23 }
 0x3b7   : > { %1963 = vmatprep.mubr.bf16.mxu0 %v2218_v27  ;;  %1971 = vmatprep.mubr.bf16.mxu1 %v2219_v28  ;;  %s3014_s8 = smov (!%p1227_p3, %s1231_s8), %s1230_s23  ;;  %v1721_v40 = vld [vmem:[%s429_s27] ss:$0 sm:$0xff] }
 0x3b8   : > { %v1045_v29 = vld [vmem:[#allocation2 + $0x18] sm:$0xff]  ;;  %p1732_p8 = scmp.lt.s32.totalorder %s3014_s8, 0  ;;  %s1237_s24 = sadd.s32 2, %s3014_s8 }
 0x3b9   : > { %v1044_v26 = vld [vmem:[#allocation2 + $0x10] sm:$0xff]  ;;  %1950 = vmatpush3.bf16.msra.mxu0 %v1043_v25  ;;  %2096 = vmatpush3.bf16.msra.mxu1 %v1043_v25  ;;  %v1049_v33 = vld [vmem:[#allocation2 + $0x38] sm:$0xff] }
 0x3ba   : > { %1951 = vmatprep.subr.bf16.mxu0 %v1044_v26  ;;  %2089 = vmatprep.subr.bf16.mxu1 %v1044_v26  ;;  %v1048_v32 = vld [vmem:[#allocation2 + $0x30] sm:$0xff]  ;;  %s3016_s24 = smov (!%p1732_p8, %s1237_s24), %s3014_s8 }
 0x3bb   : > { %p1733_p11 = scmp.ne.s32.totalorder %s3016_s24, 0 }
 0x3bd   : > { %1952 = vmatpush3.bf16.msra.mxu0 %v1044_v26  ;;  %2097 = vmatpush3.bf16.msra.mxu1 %v1044_v26 }
 0x3be   : > { %1953 = vmatprep.subr.bf16.mxu0 %v1045_v29  ;;  %2090 = vmatprep.subr.bf16.mxu1 %v1045_v29 }
 0x3c1   : > { %1954 = vmatpush3.bf16.msra.mxu0 %v1045_v29  ;;  %2098 = vmatpush3.bf16.msra.mxu1 %v1045_v29 }
 0x3c2   : > { %1955 = vmatprep.subr.bf16.mxu0 %v1046_v30  ;;  %2091 = vmatprep.subr.bf16.mxu1 %v1046_v30 }
 0x3c5   : > { %1956 = vmatpush3.bf16.msra.mxu0 %v1046_v30  ;;  %2099 = vmatpush3.bf16.msra.mxu1 %v1046_v30 }
 0x3c6   : > { %1957 = vmatprep.subr.bf16.mxu0 %v1047_v31  ;;  %2092 = vmatprep.subr.bf16.mxu1 %v1047_v31 }
 0x3c9   : > { %1958 = vmatpush3.bf16.msra.mxu0 %v1047_v31  ;;  %2100 = vmatpush3.bf16.msra.mxu1 %v1047_v31 }
 0x3ca   : > { %1959 = vmatprep.subr.bf16.mxu0 %v1048_v32  ;;  %2093 = vmatprep.subr.bf16.mxu1 %v1048_v32 }
 0x3cd   : > { %1960 = vmatpush3.bf16.msra.mxu0 %v1048_v32  ;;  %2101 = vmatpush3.bf16.msra.mxu1 %v1048_v32 }
 0x3ce   : > { %1961 = vmatprep.subr.bf16.mxu0 %v1049_v33  ;;  %2094 = vmatprep.subr.bf16.mxu1 %v1049_v33 }
 0x3d1   : > { %1962 = vmatpush3.bf16.msra.mxu0 %v1049_v33  ;;  %2102 = vmatpush3.bf16.msra.mxu1 %v1049_v33 }
 0x3d4   : > { %1964 = vmatmul.mubr.bf16.vlgmr.msra.gmra.mrb[0].mxu0 %v2220_v34  ;;  %1972 = vmatmul.mubr.bf16.vlgmr.msra.gmra.mrb[0].mxu1 %v2221_v35 }
 0x3d5   : > { %1967 = vmatprep.mubr.bf16.mxu0 %v2222_v36  ;;  %1975 = vmatprep.mubr.bf16.mxu1 %v2223_v37 }
 0x3dc   : > { %1968 = vmatmul.mubr.bf16.gmra.mrb[4].mxu0 %v2224_v38  ;;  %1976 = vmatmul.mubr.bf16.gmra.mrb[4].mxu1 %v2225_v39 }
 0x4a7   : > { %v1965_v41 = vpop.f32.mrb[0].mxu0  ;;  %v1973_v42 = vpop.f32.mrb[0].mxu1 }
 0x4a8   : > { %v1148_v43 = vadd.f32 %v1965_v41, %v1721_v40  ;;  %v1180_v44 = vadd.f32 %v1973_v42, %v1721_v40  ;;  %v1139_v45 = vpop.f32.mrb[1].mxu0  ;;  %v1171_v46 = vpop.f32.mrb[1].mxu1 }
 0x4a9   : > { %v1140_v47 = vadd.f32 %v1721_v40, %v1139_v45  ;;  %v1172_v48 = vadd.f32 %v1721_v40, %v1171_v46  ;;  %v1966_v49 = vpop.f32.mrb[2].mxu0  ;;  %v1974_v50 = vpop.f32.mrb[2].mxu1 }
 0x4aa   : > { %v1151_v51 = vadd.f32 %v1966_v49, %v1721_v40  ;;  %v1183_v52 = vadd.f32 %v1974_v50, %v1721_v40  ;;  %v1142_v0 = vpop.f32.mrb[3].mxu0  ;;  %v1174_v1 = vpop.f32.mrb[3].mxu1  ;;  %v1204_v4 = vmax.f32 %v1148_v43, 0.0  ;;  %v1212_v5 = vmax.f32 %v1180_v44, 0.0 }
 0x4ab   : > { %v1143_v2 = vadd.f32 %v1721_v40, %v1142_v0  ;;  %v1175_v3 = vadd.f32 %v1721_v40, %v1174_v1  ;;  %v1202_v8 = vmax.f32 %v1140_v47, 0.0  ;;  %v1210_v9 = vmax.f32 %v1172_v48, 0.0 }
 0x4ac   : > { %v1205_v6 = vmax.f32 %v1151_v51, 0.0  ;;  %v1213_v7 = vmax.f32 %v1183_v52, 0.0 }
 0x4ad   : > { %v1203_v10 = vmax.f32 %v1143_v2, 0.0  ;;  %v1211_v11 = vmax.f32 %v1175_v3, 0.0 }
 0x4ae   : > { %v1219_v12 = vpack.c.bf16 %v1205_v6, %v1204_v4  ;;  %v1223_v13 = vpack.c.bf16 %v1213_v7, %v1212_v5 }
 0x4af   : > { %v1218_v14 = vpack.c.bf16 %v1203_v10, %v1202_v8  ;;  %v1222_v15 = vpack.c.bf16 %v1211_v11, %v1210_v9  ;;  %v1969_v53 = vpop.f32.mrb[4].mxu0  ;;  %v1977_v54 = vpop.f32.mrb[4].mxu1 }
 0x4b0   : > { %v1164_v55 = vadd.f32 %v1969_v53, %v1721_v40  ;;  %v1196_v56 = vadd.f32 %v1977_v54, %v1721_v40  ;;  %v1155_v57 = vpop.f32.mrb[5].mxu0  ;;  %v1187_v58 = vpop.f32.mrb[5].mxu1  ;;  %1248 = vst [vmem:[#allocation3 + $0x8] sm:$0xff] (!%p1733_p11), %v1219_v12  ;;  %1252 = vst [vmem:[#allocation3 + $0x28] sm:$0xff] (!%p1733_p11), %v1223_v13 }
 0x4b1   : > { %v1156_v59 = vadd.f32 %v1721_v40, %v1155_v57  ;;  %v1188_v60 = vadd.f32 %v1721_v40, %v1187_v58  ;;  %v1970_v61 = vpop.f32.mrb[6].mxu0  ;;  %v1978_v62 = vpop.f32.mrb[6].mxu1  ;;  %1242 = sbr.rel (%p1733_p11) target bundleno = 1210 (0x4ba), region = 96  ;;  %1247 = vst [vmem:[#allocation3] sm:$0xff] (!%p1733_p11), %v1218_v14  ;;  %1251 = vst [vmem:[#allocation3 + $0x20] sm:$0xff] (!%p1733_p11), %v1222_v15 }
 0x4b2   : > { %v1167_v63 = vadd.f32 %v1970_v61, %v1721_v40  ;;  %v1199_v16 = vadd.f32 %v1978_v62, %v1721_v40  ;;  %v1158_v17 = vpop.f32.mrb[7].mxu0  ;;  %v1190_v18 = vpop.f32.mrb[7].mxu1  ;;  %v1208_v21 = vmax.f32 %v1164_v55, 0.0  ;;  %v1216_v22 = vmax.f32 %v1196_v56, 0.0 }
 0x4b3   : > { %v1159_v19 = vadd.f32 %v1721_v40, %v1158_v17  ;;  %v1191_v20 = vadd.f32 %v1721_v40, %v1190_v18  ;;  %v1206_v25 = vmax.f32 %v1156_v59, 0.0  ;;  %v1214_v26 = vmax.f32 %v1188_v60, 0.0 }
 0x4b4   : > { %v1209_v23 = vmax.f32 %v1167_v63, 0.0  ;;  %v1217_v24 = vmax.f32 %v1199_v16, 0.0 }
 0x4b5   : > { %v1207_v27 = vmax.f32 %v1159_v19, 0.0  ;;  %v1215_v28 = vmax.f32 %v1191_v20, 0.0 }
 0x4b6   : > { %v1221_v29 = vpack.c.bf16 %v1209_v23, %v1208_v21  ;;  %v1225_v30 = vpack.c.bf16 %v1217_v24, %v1216_v22 }
 0x4b7   : > { %v1220_v31 = vpack.c.bf16 %v1207_v27, %v1206_v25  ;;  %v1224_v32 = vpack.c.bf16 %v1215_v28, %v1214_v26 }
 0x4b8   : > { %1250 = vst [vmem:[#allocation3 + $0x18] sm:$0xff] %v1221_v29  ;;  %1254 = vst [vmem:[#allocation3 + $0x38] sm:$0xff] %v1225_v30 }
 0x4b9   : > { %1249 = vst [vmem:[#allocation3 + $0x10] sm:$0xff] %v1220_v31  ;;  %1253 = vst [vmem:[#allocation3 + $0x30] sm:$0xff] %v1224_v32 }
 0x4ba PF: > { %p1734_p9 = scmp.ne.s32.totalorder %s3016_s24, 1 }
 0x4bb   : > { %1263 = vst [vmem:[#allocation4] sm:$0xff] (!%p1734_p9), %v1218_v14  ;;  %1264 = vst [vmem:[#allocation4 + $0x8] sm:$0xff] (!%p1734_p9), %v1219_v12 }
 0x4bc   : > { %1258 = sbr.rel (%p1734_p9) target bundleno = 1219 (0x4c3), region = 100  ;;  %1265 = vst [vmem:[#allocation4 + $0x10] sm:$0xff] (!%p1734_p9), %v1220_v31  ;;  %1266 = vst [vmem:[#allocation4 + $0x18] sm:$0xff] (!%p1734_p9), %v1221_v29 }
 0x4bd   : > { %1267 = vst [vmem:[#allocation4 + $0x20] sm:$0xff] (!%p1734_p9), %v1222_v15  ;;  %1268 = vst [vmem:[#allocation4 + $0x28] sm:$0xff] (!%p1734_p9), %v1223_v13 }
 0x4be   : > { %1269 = vst [vmem:[#allocation4 + $0x30] sm:$0xff] (!%p1734_p9), %v1224_v32  ;;  %1270 = vst [vmem:[#allocation4 + $0x38] sm:$0xff] (!%p1734_p9), %v1225_v30 }
 0x4c3 PF: > { %p1271_p4 = scmp.eq.s32.totalorder %s2472_s12, 2 }
 0x4c4   : > { %v1277_v33 = vld [vmem:[#allocation3] sm:$0xff] (%p1271_p4)  ;;  %v2489_v34 = vmov (%p1271_p4), 0.0   ;;  %vm2490_vm0 = vmmov (%p1271_p4), 0   ;;  %v1278_v35 = vld [vmem:[#allocation3 + $0x8] sm:$0xff] (%p1271_p4)  ;;  %v1279_v38 = vld [vmem:[#allocation3 + $0x10] sm:$0xff] (%p1271_p4)  ;;  %s3002_s17 = sld [smem:[#allocation21_spill]] (%p1271_p4) }
 0x4c5   : > { %1275 = sbr.rel (!%p1271_p4) target bundleno = 1900 (0x76c), region = 104  ;;  %1979 = vmatprep.subr.bf16.mxu0 (%p1271_p4), %v2489_v34  ;;  %1995 = vmatprep.mubr.msk.bf16.mxu0 (%p1271_p4), %vm2490_vm0, %v2489_v34  ;;  %v2226_v36 = vld [vmem:[#allocation11] sm:$0xff] (%p1271_p4)   ;;  %v2227_v37 = vld [vmem:[#allocation11 + $0x8] sm:$0xff] (%p1271_p4)   ;;  %v1280_v39 = vld [vmem:[#allocation3 + $0x18] sm:$0xff] (%p1271_p4)  ;;  %s3003_s16 = sld [smem:[#allocation22_spill]] (%p1271_p4) }
 0x4c6   : > { %1980 = vmatpush3.bf16.msra.mxu0 (%p1271_p4), %v1277_v33  ;;  %1999 = vmatprep.subr.bf16.mxu1 (%p1271_p4), %v2489_v34  ;;  %v2228_v40 = vld [vmem:[#allocation11 + $0x10] sm:$0xff] (%p1271_p4)   ;;  %v2229_v41 = vld [vmem:[#allocation11 + $0x18] sm:$0xff] (%p1271_p4)   ;;  %v1281_v42 = vld [vmem:[#allocation3 + $0x20] sm:$0xff] (%p1271_p4) }
 0x4c7   : > { %1981 = vmatprep.subr.bf16.mxu0 (%p1271_p4), %v2489_v34  ;;  %2015 = vmatprep.mubr.msk.bf16.mxu1 (%p1271_p4), %vm2490_vm0, %v2489_v34  ;;  %v2230_v43 = vld [vmem:[#allocation11 + $0x20] sm:$0xff] (%p1271_p4)   ;;  %v1282_v44 = vld [vmem:[#allocation3 + $0x28] sm:$0xff] (%p1271_p4)  ;;  %v1283_v46 = vld [vmem:[#allocation3 + $0x30] sm:$0xff] (%p1271_p4) }
 0x4c8   : > { %2000 = vmatpush3.bf16.msra.mxu1 (%p1271_p4), %v2226_v36  ;;  %v2231_v45 = vld [vmem:[#allocation11 + $0x28] sm:$0xff] (%p1271_p4)   ;;  %v2232_v47 = vld [vmem:[#allocation11 + $0x30] sm:$0xff] (%p1271_p4)   ;;  %v1284_v48 = vld [vmem:[#allocation3 + $0x38] sm:$0xff] (%p1271_p4) }
 0x4c9   : > { %2001 = vmatprep.subr.bf16.mxu1 (%p1271_p4), %v2489_v34  ;;  %v1276_v49 = vld [vmem:[%s2974_s4] sm:$0xf] (%p1271_p4)  ;;  %v2233_v50 = vld [vmem:[#allocation11 + $0x38] sm:$0xff] (%p1271_p4)   ;;  %v2235_v52 = vld [vmem:[#allocation12 + $0x8] sm:$0xff] (%p1271_p4)  }
 0x4ca   : > { %1982 = vmatpush3.bf16.msra.mxu0 (%p1271_p4), %v1278_v35  ;;  %v2234_v51 = vld [vmem:[#allocation12] sm:$0xff] (%p1271_p4)   ;;  %v2236_v0 = vld [vmem:[#allocation12 + $0x10] sm:$0xff] (%p1271_p4)   ;;  %v2237_v1 = vld [vmem:[#allocation12 + $0x18] sm:$0xff] (%p1271_p4)  }
 0x4cb   : > { %1983 = vmatprep.subr.bf16.mxu0 (%p1271_p4), %v2489_v34  ;;  %v2238_v2 = vld [vmem:[#allocation12 + $0x20] sm:$0xff] (%p1271_p4)   ;;  %v2239_v3 = vld [vmem:[#allocation12 + $0x28] sm:$0xff] (%p1271_p4)   ;;  %v2240_v9 = vld [vmem:[#allocation12 + $0x30] sm:$0xff] (%p1271_p4)  }
 0x4cc   : > { %2002 = vmatpush3.bf16.msra.mxu1 %v2227_v37  ;;  %v2241_v10 = vld [vmem:[#allocation12 + $0x38] sm:$0xff]   ;;  %v1736_v11 = vld [vmem:[%s3002_s17] ss:$0 sm:$0xff] }
 0x4cd   : > { %2003 = vmatprep.subr.bf16.mxu1 %v2489_v34  ;;  %v1745_v56 = vld [vmem:[%s3003_s16] ss:$0 sm:$0xff] }
 0x4ce   : > { %1984 = vmatpush3.bf16.msra.mxu0 %v1279_v38 }
 0x4cf   : > { %1985 = vmatprep.subr.bf16.mxu0 %v2489_v34 }
 0x4d0   : > { %2004 = vmatpush3.bf16.msra.mxu1 %v2228_v40 }
 0x4d1   : > { %2005 = vmatprep.subr.bf16.mxu1 %v2489_v34 }
 0x4d2   : > { %1986 = vmatpush3.bf16.msra.mxu0 %v1280_v39 }
 0x4d3   : > { %1987 = vmatprep.subr.bf16.mxu0 %v2489_v34 }
 0x4d4   : > { %2006 = vmatpush3.bf16.msra.mxu1 %v2229_v41 }
 0x4d5   : > { %2007 = vmatprep.subr.bf16.mxu1 %v2489_v34 }
 0x4d6   : > { %1988 = vmatpush3.bf16.msra.mxu0 %v1281_v42 }
 0x4d7   : > { %1989 = vmatprep.subr.bf16.mxu0 %v2489_v34 }
 0x4d8   : > { %2008 = vmatpush3.bf16.msra.mxu1 %v2230_v43 }
 0x4d9   : > { %2009 = vmatprep.subr.bf16.mxu1 %v2489_v34 }
 0x4da   : > { %1990 = vmatpush3.bf16.msra.mxu0 %v1282_v44 }
 0x4db   : > { %1991 = vmatprep.subr.bf16.mxu0 %v2489_v34 }
 0x4dc   : > { %2010 = vmatpush3.bf16.msra.mxu1 %v2231_v45 }
 0x4dd   : > { %2011 = vmatprep.subr.bf16.mxu1 %v2489_v34 }
 0x4de   : > { %1992 = vmatpush3.bf16.msra.mxu0 %v1283_v46 }
 0x4df   : > { %1993 = vmatprep.subr.bf16.mxu0 %v2489_v34 }
 0x4e0   : > { %2012 = vmatpush3.bf16.msra.mxu1 %v2232_v47 }
 0x4e1   : > { %2013 = vmatprep.subr.bf16.mxu1 %v2489_v34 }
 0x4e2   : > { %1994 = vmatpush3.bf16.msra.mxu0 %v1284_v48 }
 0x4e3   : > { %2019 = vmatprep.subr.bf16.mxu0 %v2489_v34 }
 0x4e4   : > { %2014 = vmatpush3.bf16.msra.mxu1 %v2233_v50 }
 0x4e5   : > { %1996 = vmatmul.mubr.bf16.vlgmr.msra.gmra.mrb[0].mxu0 %v1276_v49 }
 0x4e6   : > { %2035 = vmatprep.mubr.msk.bf16.mxu0 %vm2490_vm0, %v2489_v34  ;;  %2020 = vmatpush3.bf16.msra.mxu0 %v2234_v51 }
 0x4e7   : > { %2021 = vmatprep.subr.bf16.mxu0 %v2489_v34 }
 0x4ea   : > { %2022 = vmatpush3.bf16.msra.mxu0 %v2235_v52 }
 0x4eb   : > { %2023 = vmatprep.subr.bf16.mxu0 %v2489_v34 }
 0x4ee   : > { %2024 = vmatpush3.bf16.msra.mxu0 %v2236_v0 }
 0x4ef   : > { %2025 = vmatprep.subr.bf16.mxu0 %v2489_v34 }
 0x4f2   : > { %2026 = vmatpush3.bf16.msra.mxu0 %v2237_v1 }
 0x4f3   : > { %2027 = vmatprep.subr.bf16.mxu0 %v2489_v34 }
 0x4f6   : > { %2028 = vmatpush3.bf16.msra.mxu0 %v2238_v2 }
 0x4f7   : > { %2029 = vmatprep.subr.bf16.mxu0 %v2489_v34 }
 0x4fa   : > { %2030 = vmatpush3.bf16.msra.mxu0 %v2239_v3 }
 0x4fb   : > { %2031 = vmatprep.subr.bf16.mxu0 %v2489_v34 }
 0x4fe   : > { %2032 = vmatpush3.bf16.msra.mxu0 %v2240_v9 }
 0x4ff   : > { %2033 = vmatprep.subr.bf16.mxu0 %v2489_v34 }
 0x502   : > { %2034 = vmatpush3.bf16.msra.mxu0 %v2241_v10 }
 0x5b8   : > { %v1319_v4 = vpop.f32.mrb[0].mxu0 }
 0x5b9   : > { %v1325_v5 = vpack.c.bf16 %v1319_v4, %v1319_v4  ;;  %v1997_v6 = vpop.f32.mrb[1].mxu0 }
 0x5ba   : > { %v1322_v7 = vpop.f32.mrb[2].mxu0 }
 0x5bb   : > { %v1998_v8 = vpop.f32.mrb[3].mxu0  ;;  %2016 = vmatmul.mubr.bf16.vlgmr.msra.gmra.mrb[0].mxu1 %v1325_v5 }
 0x68e   : > { %v1431_v12 = vpop.f32.mrb[0].mxu1 }
 0x68f   : > { %v1432_v13 = vadd.f32 %v1736_v11, %v1431_v12  ;;  %v2017_v14 = vpop.f32.mrb[1].mxu1 }
 0x690   : > { %v1434_v15 = vpop.f32.mrb[2].mxu1 }
 0x691   : > { %v1437_v53 = vmax.f32 %v1432_v13, 0.0  ;;  %v2018_v54 = vpop.f32.mrb[3].mxu1 }
 0x693   : > { %v1438_v55 = vpack.c.bf16 %v1437_v53, %v1437_v53 }
 0x695   : > { %2036 = vmatmul.mubr.bf16.vlgmr.msra.gmra.mrb[4].mxu0 %v1438_v55 }
 0x768   : > { %v1544_v57 = vpop.f32.mrb[4].mxu0 }
 0x769   : > { %v1545_v58 = vadd.f32 %v1745_v56, %v1544_v57  ;;  %v2037_v59 = vpop.f32.mrb[5].mxu0 }
 0x76a   : > { %v1547_v60 = vpop.f32.mrb[6].mxu0 }
 0x76b   : > { %1550 = vst [vmem:[#allocation14] sm:$0xff] %v1545_v58  ;;  %v2038_v61 = vpop.f32.mrb[7].mxu0 }
 0x76c PF: > { %p2151_p7 = scmp.eq.s32.totalorder %s2571_s15, 2  ;;  %s2491_s20 = smov [#allocation14]  }
 0x76d   : > { %s1558_s27 = sshll.u32 %s2491_s20, 4  ;;  %s1559_s27 = int_to_ptr.vmem [resolvable:$true] %s1558_s27 }
 0x76e   : > { %s2384_s18 = scalar_lea.vmem %s1559_s27, 128  ;;  %p2391_p0 = scmp.lt.s32.totalorder %s1559_s27, %s1559_s27 }
 0x76f   : > { %p2385_p5 = scmp.ne.s32.totalorder %s1559_s27, %s2384_s18  ;;  %p2392_p2 = scmp.lt.s32.totalorder %s2384_s18, %s2384_s18 }
 0x771   : > { %p2386_p12 = pnand %p2385_p5, %p2151_p7  ;;  %p2393_p6 = por %p2392_p2, %p2391_p0 }
 0x773   : > { %p2387_p13 = pneg %p2386_p12 }
 0x775   : > { %p2394_p10 = pnand %p2393_p6, %p2387_p13 }
 0x777   : > { %2397 = shalt.err (!%p2394_p10)
}
 0x778   : > { %s3004_s8 = sld [smem:[#allocation23_spill]] }
 0x77e   : > { %s2398_s24 = scalar_lea.hbm %s3004_s8, 128 }
 0x77f   : > { %p2399_p1 = scmp.ne.s32.totalorder %s3004_s8, %s2398_s24  ;;  %p2404_p11 = scmp.lt.u32.totalorder %s2398_s24, %s3004_s8 }
 0x781   : > { %p2400_p3 = pnand %p2399_p1, %p2151_p7 }
 0x783   : > { %p2401_p8 = pneg %p2400_p3 }
 0x785   : > { %p2406_p9 = pnand %p2404_p11, %p2401_p8 }
 0x787   : > { %2409 = shalt.err (!%p2406_p9)
}
 0x788   : > { %2122 = dma.vmem_to_hbm [thread:$0]  (%p2151_p7), %s1559_s27, 128, %s3004_s8, [#allocation7]  }
 0x789   : > { %2455 = dma.done.wait (%p2151_p7), [#allocation7], 128  }
 0x78a   : > { %2457 = vsyncadd (%p2151_p7), [#allocation7], 4294967168 }
 0x78b PF: > { %s23_s14 = sadd.s32 1, %s2480_s14   ;;  %s3005_s17 = smov %s3012_s30 }
 0x78c   : > { %p20_p4 = scmp.ge.s32.totalorder %s23_s14, 5   ;;  %s3006_s30 = smov %s2464_s10 }
 0x78d   : > { %s3007_s10 = smov %s2468_s11  ;;  %s3008_s11 = smov %s2716_s21 }
 0x78e   : > { %s3009_s12 = smov %s2476_s13  ;;  %s3010_s13 = smov %s3005_s17 }
 0x78f   :  { %22 = sbr.rel (!%p20_p4) target bundleno = 10 (0xa), region = 142 }
 0x796   :  { %1571 = vsyncpa [#allocation6], 1 }
 0x797   :  { %1573 = vsyncpa [#allocation6 + $0x1], 1 }
 0x798   :  { %1574 = vsyncpa [#allocation9], 1 }
 0x799   :  { %1575 = vsyncpa [#allocation13], 1 }
 0x79a   :  { %1576 = vsyncpa [#allocation7], 1 }
 0x79b   :  { %1578 = vsyncpa [#allocation7 + $0x1], 1 }

</bundles_post_ra>
